<compile_context>
chip_gen: v7x
topology: tpu7x:2x2x1
jax: 0.10.0
libtpu: 0.0.40
codegen_flags: <defaults>
</compile_context>

<pallas_src>
import numpy as np
import jax
import jax.numpy as jnp
from jax.experimental import pallas as pl
from jax.experimental.pallas import tpu as pltpu


# ----------------------------------------------------------------------------
# Fused kernel: 4 x (ConvTranspose2d -> ReLU), everything VMEM-resident.
# Per layer:  out = relu( sum_kh  S[kh] @ (A @ M[kh]) )
#   A     : (N*H , W*Cin)     activation, rows=(n,h), cols=(w,ci)
#   M[kh] : (W*Cin, Wo*Cout)  channel GEMM fused with the W-axis overlap-add
#   S[kh] : (N*Ho, N*H)       0/1 H-axis overlap-add (block-diag over batch)
# ----------------------------------------------------------------------------
def _gen_ecal_kernel(x_ref, m1_ref, s1_ref, m2_ref, s2_ref,
                     m3_ref, s3_ref, m4_ref, s4_ref, o_ref):

    def deconv_relu(a, m_ref, s_ref):
        acc = None
        for kh in range(m_ref.shape[0]):           # unrolled: k <= 4 taps
            b = jnp.dot(a, m_ref[kh], preferred_element_type=jnp.float32)
            c = jnp.dot(s_ref[kh], b, preferred_element_type=jnp.float32)
            acc = c if acc is None else acc + c
        return jnp.maximum(acc, 0.0)                # fused ReLU (VPU filler)

    a = x_ref[...]                                  # (N, nz)
    a = deconv_relu(a, m1_ref, s1_ref)              # (N*4 , 4*nfx4)
    a = deconv_relu(a, m2_ref, s2_ref)              # (N*8 , 8*nfx2)
    a = deconv_relu(a, m3_ref, s3_ref)              # (N*16, 16*imgSize)
    a = deconv_relu(a, m4_ref, s4_ref)              # (N*30, 30*nc)
    o_ref[...] = a


# ----------------------------------------------------------------------------
# Init-time weight pre-packing (done once, outside the jitted forward)
# ----------------------------------------------------------------------------
def _pack_layer(w, H, W, stride, pad, batch):
    """Pack one ConvTranspose2d weight (Cin,Cout,k,k) into per-tap operands."""
    w = np.asarray(w, dtype=np.float32)
    cin, cout, k, _ = w.shape
    ho = (H - 1) * stride - 2 * pad + k
    wo = (W - 1) * stride - 2 * pad + k

    # M[kh]: channel contraction + W-axis col2im as one (W*Cin, Wo*Cout) GEMM op.
    m = np.zeros((k, W * cin, wo * cout), np.float32)
    for kh in range(k):
        for wi in range(W):
            for kw in range(k):
                ow = stride * wi + kw - pad
                if 0 <= ow < wo:
                    m[kh, wi * cin:(wi + 1) * cin,
                         ow * cout:(ow + 1) * cout] += w[:, :, kh, kw]

    # S[kh]: 0/1 H-axis col2im scatter, block-diagonal over the batch.
    s1 = np.zeros((k, ho, H), np.float32)
    for kh in range(k):
        for h in range(H):
            oh = stride * h + kh - pad
            if 0 <= oh < ho:
                s1[kh, oh, h] = 1.0
    eye = np.eye(batch, dtype=np.float32)
    s = np.stack([np.kron(eye, s1[kh]) for kh in range(k)])    # (k, N*Ho, N*H)

    return jnp.asarray(m), jnp.asarray(s), ho, wo, cout


def make_gen_ecal_forward(w1, w2, w3, w4, batch):
    """Pre-packs weights once; returns a jitted forward(x) for a fixed batch."""
    nz = w1.shape[0]
    m1, s1, h1, w1o, c1 = _pack_layer(w1, 1, 1, 1, 0, batch)
    m2, s2, h2, w2o, c2 = _pack_layer(w2, h1, w1o, 2, 1, batch)
    m3, s3, h3, w3o, c3 = _pack_layer(w3, h2, w2o, 2, 1, batch)
    m4, s4, h4, w4o, c4 = _pack_layer(w4, h3, w3o, 2, 1, batch)

    packed = (m1, s1, m2, s2, m3, s3, m4, s4)
    out_rows, out_cols = batch * h4, w4o * c4

    def full_spec(shape):
        nd = len(shape)
        return pl.BlockSpec(shape, lambda i, _nd=nd: (0,) * _nd)

    in_specs = [full_spec((batch, nz))] + [full_spec(p.shape) for p in packed]

    fused = pl.pallas_call(
        _gen_ecal_kernel,
        out_shape=jax.ShapeDtypeStruct((out_rows, out_cols), jnp.float32),
        grid_spec=pltpu.PrefetchScalarGridSpec(
            num_scalar_prefetch=0,
            grid=(1,),                              # single VMEM-resident step
            in_specs=in_specs,
            out_specs=full_spec((out_rows, out_cols)),
        ),
        compiler_params=pltpu.CompilerParams(
            dimension_semantics=("arbitrary",),
        ),
    )

    @jax.jit
    def _forward(x, *mats):
        x2d = x.reshape(batch, nz)                  # (N, nz, 1, 1) -> (N, nz)
        out2d = fused(x2d, *mats)                   # (N*Ho, Wo*nc)
        out = out2d.reshape(batch, h4, w4o, c4)     # NHWC
        return jnp.transpose(out, (0, 3, 1, 2))     # NCHW

    def forward(x):
        return _forward(x, *packed)

    return forward


# ----------------------------------------------------------------------------
# Pure-JAX reference (lax.conv_general_dilated) for the correctness check
# ----------------------------------------------------------------------------
def _ref_convT_relu(x, w, s, p):
    k = w.shape[-1]
    wk = jnp.transpose(w[:, :, ::-1, ::-1], (1, 0, 2, 3))   # (Cout, Cin, k, k)
    q = k - 1 - p
    y = jax.lax.conv_general_dilated(
        x, wk, window_strides=(1, 1), padding=[(q, q), (q, q)],
        lhs_dilation=(s, s), dimension_numbers=("NCHW", "OIHW", "NCHW"))
    return jnp.maximum(y, 0.0)


def _ref_forward(x, w1, w2, w3, w4):
    h = _ref_convT_relu(x, w1, 1, 0)
    h = _ref_convT_relu(h, w2, 2, 1)
    h = _ref_convT_relu(h, w3, 2, 1)
    h = _ref_convT_relu(h, w4, 2, 1)
    return h


if __name__ == "__main__":
    # Small problem: nz=8, nf=4 (nfx4=16, nfx2=8), imgSize=16, nc=3, batch=2
    nz, nf, img_size, nc, batch = 8, 4, 16, 3, 2
    nfx4, nfx2 = nf * 4, nf * 2

    key = jax.random.PRNGKey(0)
    kx, k1, k2, k3, k4 = jax.random.split(key, 5)

    # DCGAN generator input is (N, nz, 1, 1)
    x = jax.random.normal(kx, (batch, nz, 1, 1), dtype=jnp.float32)

    # ConvTranspose2d weights, PyTorch layout (Cin, Cout, kH, kW), bias=False
    w1 = 0.05 * jax.random.normal(k1, (nz, nfx4, 4, 4), dtype=jnp.float32)
    w2 = 0.05 * jax.random.normal(k2, (nfx4, nfx2, 4, 4), dtype=jnp.float32)
    w3 = 0.05 * jax.random.normal(k3, (nfx2, img_size, 4, 4), dtype=jnp.float32)
    w4 = 0.05 * jax.random.normal(k4, (img_size, nc, 2, 2), dtype=jnp.float32)

    forward = make_gen_ecal_forward(w1, w2, w3, w4, batch)

    out = jax.block_until_ready(forward(x))
    assert out.shape == (batch, nc, 30, 30), out.shape

    ref = jax.block_until_ready(_ref_forward(x, w1, w2, w3, w4))
    np.testing.assert_allclose(np.asarray(out), np.asarray(ref),
                               rtol=1e-4, atol=1e-4)

    print("KERNEL_OK")
</pallas_src>

<mosaic_0001>
module attributes {stable_mosaic.version = 11 : i64} {
  func.func @_gen_ecal_kernel(%arg0: i32, %arg1: memref<2x8xf32, #tpu.memory_space<vmem>>, %arg2: memref<4x8x64xf32, #tpu.memory_space<vmem>>, %arg3: memref<4x8x2xf32, #tpu.memory_space<vmem>>, %arg4: memref<4x64x64xf32, #tpu.memory_space<vmem>>, %arg5: memref<4x16x8xf32, #tpu.memory_space<vmem>>, %arg6: memref<4x64x256xf32, #tpu.memory_space<vmem>>, %arg7: memref<4x32x16xf32, #tpu.memory_space<vmem>>, %arg8: memref<2x256x90xf32, #tpu.memory_space<vmem>>, %arg9: memref<2x60x32xf32, #tpu.memory_space<vmem>>, %arg10: memref<60x90xf32, #tpu.memory_space<vmem>>) attributes {dimension_semantics = [#tpu.dimension_semantics<arbitrary>], iteration_bounds = array<i64: 1>, scalar_prefetch = 0 : i64, scratch_operands = 0 : i64, tpu.core_type = #tpu.core_type<tc>, window_params = [{pipeline_mode = #tpu.pipeline_mode<synchronous>, transform_indices = @transform_0, window_bounds = array<i64: 2, 8>}, {pipeline_mode = #tpu.pipeline_mode<synchronous>, transform_indices = @transform_1, window_bounds = array<i64: 4, 8, 64>}, {pipeline_mode = #tpu.pipeline_mode<synchronous>, transform_indices = @transform_2, window_bounds = array<i64: 4, 8, 2>}, {pipeline_mode = #tpu.pipeline_mode<synchronous>, transform_indices = @transform_3, window_bounds = array<i64: 4, 64, 64>}, {pipeline_mode = #tpu.pipeline_mode<synchronous>, transform_indices = @transform_4, window_bounds = array<i64: 4, 16, 8>}, {pipeline_mode = #tpu.pipeline_mode<synchronous>, transform_indices = @transform_5, window_bounds = array<i64: 4, 64, 256>}, {pipeline_mode = #tpu.pipeline_mode<synchronous>, transform_indices = @transform_6, window_bounds = array<i64: 4, 32, 16>}, {pipeline_mode = #tpu.pipeline_mode<synchronous>, transform_indices = @transform_7, window_bounds = array<i64: 2, 256, 90>}, {pipeline_mode = #tpu.pipeline_mode<synchronous>, transform_indices = @transform_8, window_bounds = array<i64: 2, 60, 32>}, {pipeline_mode = #tpu.pipeline_mode<synchronous>, transform_indices = @transform_9, window_bounds = array<i64: 60, 90>}]} {
    %c0 = arith.constant 0 : index
    %c0_0 = arith.constant 0 : index
    %0 = vector.load %arg1[%c0, %c0_0] : memref<2x8xf32, #tpu.memory_space<vmem>>, vector<2x8xf32>
    %c0_1 = arith.constant 0 : index
    %c0_2 = arith.constant 0 : index
    %c0_3 = arith.constant 0 : index
    %1 = vector.load %arg2[%c0_1, %c0_2, %c0_3] : memref<4x8x64xf32, #tpu.memory_space<vmem>>, vector<1x8x64xf32>
    %2 = vector.shape_cast %1 : vector<1x8x64xf32> to vector<8x64xf32>
    %cst = arith.constant dense<0.000000e+00> : vector<2x64xf32>
    %3 = tpu.matmul %0, %2, %cst {dimension_numbers = #tpu.dot_dimension_numbers<[1], [0], [0], [1], [0, 0, 1, 1], [], []>} : vector<2x8xf32>, vector<8x64xf32>, vector<2x64xf32> -> vector<2x64xf32>
    %c0_4 = arith.constant 0 : index
    %c0_5 = arith.constant 0 : index
    %c0_6 = arith.constant 0 : index
    %4 = vector.load %arg3[%c0_4, %c0_5, %c0_6] : memref<4x8x2xf32, #tpu.memory_space<vmem>>, vector<1x8x2xf32>
    %5 = vector.shape_cast %4 : vector<1x8x2xf32> to vector<8x2xf32>
    %cst_7 = arith.constant dense<0.000000e+00> : vector<8x64xf32>
    %6 = tpu.matmul %5, %3, %cst_7 {dimension_numbers = #tpu.dot_dimension_numbers<[1], [0], [0], [1], [0, 0, 1, 1], [], []>} : vector<8x2xf32>, vector<2x64xf32>, vector<8x64xf32> -> vector<8x64xf32>
    %c1 = arith.constant 1 : index
    %c0_8 = arith.constant 0 : index
    %c0_9 = arith.constant 0 : index
    %7 = vector.load %arg2[%c1, %c0_8, %c0_9] : memref<4x8x64xf32, #tpu.memory_space<vmem>>, vector<1x8x64xf32>
    %8 = vector.shape_cast %7 : vector<1x8x64xf32> to vector<8x64xf32>
    %cst_10 = arith.constant dense<0.000000e+00> : vector<2x64xf32>
    %9 = tpu.matmul %0, %8, %cst_10 {dimension_numbers = #tpu.dot_dimension_numbers<[1], [0], [0], [1], [0, 0, 1, 1], [], []>} : vector<2x8xf32>, vector<8x64xf32>, vector<2x64xf32> -> vector<2x64xf32>
    %c1_11 = arith.constant 1 : index
    %c0_12 = arith.constant 0 : index
    %c0_13 = arith.constant 0 : index
    %10 = vector.load %arg3[%c1_11, %c0_12, %c0_13] : memref<4x8x2xf32, #tpu.memory_space<vmem>>, vector<1x8x2xf32>
    %11 = vector.shape_cast %10 : vector<1x8x2xf32> to vector<8x2xf32>
    %cst_14 = arith.constant dense<0.000000e+00> : vector<8x64xf32>
    %12 = tpu.matmul %11, %9, %cst_14 {dimension_numbers = #tpu.dot_dimension_numbers<[1], [0], [0], [1], [0, 0, 1, 1], [], []>} : vector<8x2xf32>, vector<2x64xf32>, vector<8x64xf32> -> vector<8x64xf32>
    %13 = arith.addf %6, %12 : vector<8x64xf32>
    %c2 = arith.constant 2 : index
    %c0_15 = arith.constant 0 : index
    %c0_16 = arith.constant 0 : index
    %14 = vector.load %arg2[%c2, %c0_15, %c0_16] : memref<4x8x64xf32, #tpu.memory_space<vmem>>, vector<1x8x64xf32>
    %15 = vector.shape_cast %14 : vector<1x8x64xf32> to vector<8x64xf32>
    %cst_17 = arith.constant dense<0.000000e+00> : vector<2x64xf32>
    %16 = tpu.matmul %0, %15, %cst_17 {dimension_numbers = #tpu.dot_dimension_numbers<[1], [0], [0], [1], [0, 0, 1, 1], [], []>} : vector<2x8xf32>, vector<8x64xf32>, vector<2x64xf32> -> vector<2x64xf32>
    %c2_18 = arith.constant 2 : index
    %c0_19 = arith.constant 0 : index
    %c0_20 = arith.constant 0 : index
    %17 = vector.load %arg3[%c2_18, %c0_19, %c0_20] : memref<4x8x2xf32, #tpu.memory_space<vmem>>, vector<1x8x2xf32>
    %18 = vector.shape_cast %17 : vector<1x8x2xf32> to vector<8x2xf32>
    %cst_21 = arith.constant dense<0.000000e+00> : vector<8x64xf32>
    %19 = tpu.matmul %18, %16, %cst_21 {dimension_numbers = #tpu.dot_dimension_numbers<[1], [0], [0], [1], [0, 0, 1, 1], [], []>} : vector<8x2xf32>, vector<2x64xf32>, vector<8x64xf32> -> vector<8x64xf32>
    %20 = arith.addf %13, %19 : vector<8x64xf32>
    %c3 = arith.constant 3 : index
    %c0_22 = arith.constant 0 : index
    %c0_23 = arith.constant 0 : index
    %21 = vector.load %arg2[%c3, %c0_22, %c0_23] : memref<4x8x64xf32, #tpu.memory_space<vmem>>, vector<1x8x64xf32>
    %22 = vector.shape_cast %21 : vector<1x8x64xf32> to vector<8x64xf32>
    %cst_24 = arith.constant dense<0.000000e+00> : vector<2x64xf32>
    %23 = tpu.matmul %0, %22, %cst_24 {dimension_numbers = #tpu.dot_dimension_numbers<[1], [0], [0], [1], [0, 0, 1, 1], [], []>} : vector<2x8xf32>, vector<8x64xf32>, vector<2x64xf32> -> vector<2x64xf32>
    %c3_25 = arith.constant 3 : index
    %c0_26 = arith.constant 0 : index
    %c0_27 = arith.constant 0 : index
    %24 = vector.load %arg3[%c3_25, %c0_26, %c0_27] : memref<4x8x2xf32, #tpu.memory_space<vmem>>, vector<1x8x2xf32>
    %25 = vector.shape_cast %24 : vector<1x8x2xf32> to vector<8x2xf32>
    %cst_28 = arith.constant dense<0.000000e+00> : vector<8x64xf32>
    %26 = tpu.matmul %25, %23, %cst_28 {dimension_numbers = #tpu.dot_dimension_numbers<[1], [0], [0], [1], [0, 0, 1, 1], [], []>} : vector<8x2xf32>, vector<2x64xf32>, vector<8x64xf32> -> vector<8x64xf32>
    %27 = arith.addf %20, %26 : vector<8x64xf32>
    %cst_29 = arith.constant 0.000000e+00 : f32
    %28 = vector.broadcast %cst_29 : f32 to vector<8x64xf32>
    %29 = arith.maximumf %27, %28 : vector<8x64xf32>
    %c0_30 = arith.constant 0 : index
    %c0_31 = arith.constant 0 : index
    %c0_32 = arith.constant 0 : index
    %30 = vector.load %arg4[%c0_30, %c0_31, %c0_32] : memref<4x64x64xf32, #tpu.memory_space<vmem>>, vector<1x64x64xf32>
    %31 = vector.shape_cast %30 : vector<1x64x64xf32> to vector<64x64xf32>
    %cst_33 = arith.constant dense<0.000000e+00> : vector<8x64xf32>
    %32 = tpu.matmul %29, %31, %cst_33 {dimension_numbers = #tpu.dot_dimension_numbers<[1], [0], [0], [1], [0, 0, 1, 1], [], []>} : vector<8x64xf32>, vector<64x64xf32>, vector<8x64xf32> -> vector<8x64xf32>
    %c0_34 = arith.constant 0 : index
    %c0_35 = arith.constant 0 : index
    %c0_36 = arith.constant 0 : index
    %33 = vector.load %arg5[%c0_34, %c0_35, %c0_36] : memref<4x16x8xf32, #tpu.memory_space<vmem>>, vector<1x16x8xf32>
    %34 = vector.shape_cast %33 : vector<1x16x8xf32> to vector<16x8xf32>
    %cst_37 = arith.constant dense<0.000000e+00> : vector<16x64xf32>
    %35 = tpu.matmul %34, %32, %cst_37 {dimension_numbers = #tpu.dot_dimension_numbers<[1], [0], [0], [1], [0, 0, 1, 1], [], []>} : vector<16x8xf32>, vector<8x64xf32>, vector<16x64xf32> -> vector<16x64xf32>
    %c1_38 = arith.constant 1 : index
    %c0_39 = arith.constant 0 : index
    %c0_40 = arith.constant 0 : index
    %36 = vector.load %arg4[%c1_38, %c0_39, %c0_40] : memref<4x64x64xf32, #tpu.memory_space<vmem>>, vector<1x64x64xf32>
    %37 = vector.shape_cast %36 : vector<1x64x64xf32> to vector<64x64xf32>
    %cst_41 = arith.constant dense<0.000000e+00> : vector<8x64xf32>
    %38 = tpu.matmul %29, %37, %cst_41 {dimension_numbers = #tpu.dot_dimension_numbers<[1], [0], [0], [1], [0, 0, 1, 1], [], []>} : vector<8x64xf32>, vector<64x64xf32>, vector<8x64xf32> -> vector<8x64xf32>
    %c1_42 = arith.constant 1 : index
    %c0_43 = arith.constant 0 : index
    %c0_44 = arith.constant 0 : index
    %39 = vector.load %arg5[%c1_42, %c0_43, %c0_44] : memref<4x16x8xf32, #tpu.memory_space<vmem>>, vector<1x16x8xf32>
    %40 = vector.shape_cast %39 : vector<1x16x8xf32> to vector<16x8xf32>
    %cst_45 = arith.constant dense<0.000000e+00> : vector<16x64xf32>
    %41 = tpu.matmul %40, %38, %cst_45 {dimension_numbers = #tpu.dot_dimension_numbers<[1], [0], [0], [1], [0, 0, 1, 1], [], []>} : vector<16x8xf32>, vector<8x64xf32>, vector<16x64xf32> -> vector<16x64xf32>
    %42 = arith.addf %35, %41 : vector<16x64xf32>
    %c2_46 = arith.constant 2 : index
    %c0_47 = arith.constant 0 : index
    %c0_48 = arith.constant 0 : index
    %43 = vector.load %arg4[%c2_46, %c0_47, %c0_48] : memref<4x64x64xf32, #tpu.memory_space<vmem>>, vector<1x64x64xf32>
    %44 = vector.shape_cast %43 : vector<1x64x64xf32> to vector<64x64xf32>
    %cst_49 = arith.constant dense<0.000000e+00> : vector<8x64xf32>
    %45 = tpu.matmul %29, %44, %cst_49 {dimension_numbers = #tpu.dot_dimension_numbers<[1], [0], [0], [1], [0, 0, 1, 1], [], []>} : vector<8x64xf32>, vector<64x64xf32>, vector<8x64xf32> -> vector<8x64xf32>
    %c2_50 = arith.constant 2 : index
    %c0_51 = arith.constant 0 : index
    %c0_52 = arith.constant 0 : index
    %46 = vector.load %arg5[%c2_50, %c0_51, %c0_52] : memref<4x16x8xf32, #tpu.memory_space<vmem>>, vector<1x16x8xf32>
    %47 = vector.shape_cast %46 : vector<1x16x8xf32> to vector<16x8xf32>
    %cst_53 = arith.constant dense<0.000000e+00> : vector<16x64xf32>
    %48 = tpu.matmul %47, %45, %cst_53 {dimension_numbers = #tpu.dot_dimension_numbers<[1], [0], [0], [1], [0, 0, 1, 1], [], []>} : vector<16x8xf32>, vector<8x64xf32>, vector<16x64xf32> -> vector<16x64xf32>
    %49 = arith.addf %42, %48 : vector<16x64xf32>
    %c3_54 = arith.constant 3 : index
    %c0_55 = arith.constant 0 : index
    %c0_56 = arith.constant 0 : index
    %50 = vector.load %arg4[%c3_54, %c0_55, %c0_56] : memref<4x64x64xf32, #tpu.memory_space<vmem>>, vector<1x64x64xf32>
    %51 = vector.shape_cast %50 : vector<1x64x64xf32> to vector<64x64xf32>
    %cst_57 = arith.constant dense<0.000000e+00> : vector<8x64xf32>
    %52 = tpu.matmul %29, %51, %cst_57 {dimension_numbers = #tpu.dot_dimension_numbers<[1], [0], [0], [1], [0, 0, 1, 1], [], []>} : vector<8x64xf32>, vector<64x64xf32>, vector<8x64xf32> -> vector<8x64xf32>
    %c3_58 = arith.constant 3 : index
    %c0_59 = arith.constant 0 : index
    %c0_60 = arith.constant 0 : index
    %53 = vector.load %arg5[%c3_58, %c0_59, %c0_60] : memref<4x16x8xf32, #tpu.memory_space<vmem>>, vector<1x16x8xf32>
    %54 = vector.shape_cast %53 : vector<1x16x8xf32> to vector<16x8xf32>
    %cst_61 = arith.constant dense<0.000000e+00> : vector<16x64xf32>
    %55 = tpu.matmul %54, %52, %cst_61 {dimension_numbers = #tpu.dot_dimension_numbers<[1], [0], [0], [1], [0, 0, 1, 1], [], []>} : vector<16x8xf32>, vector<8x64xf32>, vector<16x64xf32> -> vector<16x64xf32>
    %56 = arith.addf %49, %55 : vector<16x64xf32>
    %cst_62 = arith.constant 0.000000e+00 : f32
    %57 = vector.broadcast %cst_62 : f32 to vector<16x64xf32>
    %58 = arith.maximumf %56, %57 : vector<16x64xf32>
    %c0_63 = arith.constant 0 : index
    %c0_64 = arith.constant 0 : index
    %c0_65 = arith.constant 0 : index
    %59 = vector.load %arg6[%c0_63, %c0_64, %c0_65] : memref<4x64x256xf32, #tpu.memory_space<vmem>>, vector<1x64x256xf32>
    %60 = vector.shape_cast %59 : vector<1x64x256xf32> to vector<64x256xf32>
    %cst_66 = arith.constant dense<0.000000e+00> : vector<16x256xf32>
    %61 = tpu.matmul %58, %60, %cst_66 {dimension_numbers = #tpu.dot_dimension_numbers<[1], [0], [0], [1], [0, 0, 1, 1], [], []>} : vector<16x64xf32>, vector<64x256xf32>, vector<16x256xf32> -> vector<16x256xf32>
    %c0_67 = arith.constant 0 : index
    %c0_68 = arith.constant 0 : index
    %c0_69 = arith.constant 0 : index
    %62 = vector.load %arg7[%c0_67, %c0_68, %c0_69] : memref<4x32x16xf32, #tpu.memory_space<vmem>>, vector<1x32x16xf32>
    %63 = vector.shape_cast %62 : vector<1x32x16xf32> to vector<32x16xf32>
    %cst_70 = arith.constant dense<0.000000e+00> : vector<32x256xf32>
    %64 = tpu.matmul %63, %61, %cst_70 {dimension_numbers = #tpu.dot_dimension_numbers<[1], [0], [0], [1], [0, 0, 1, 1], [], []>} : vector<32x16xf32>, vector<16x256xf32>, vector<32x256xf32> -> vector<32x256xf32>
    %c1_71 = arith.constant 1 : index
    %c0_72 = arith.constant 0 : index
    %c0_73 = arith.constant 0 : index
    %65 = vector.load %arg6[%c1_71, %c0_72, %c0_73] : memref<4x64x256xf32, #tpu.memory_space<vmem>>, vector<1x64x256xf32>
    %66 = vector.shape_cast %65 : vector<1x64x256xf32> to vector<64x256xf32>
    %cst_74 = arith.constant dense<0.000000e+00> : vector<16x256xf32>
    %67 = tpu.matmul %58, %66, %cst_74 {dimension_numbers = #tpu.dot_dimension_numbers<[1], [0], [0], [1], [0, 0, 1, 1], [], []>} : vector<16x64xf32>, vector<64x256xf32>, vector<16x256xf32> -> vector<16x256xf32>
    %c1_75 = arith.constant 1 : index
    %c0_76 = arith.constant 0 : index
    %c0_77 = arith.constant 0 : index
    %68 = vector.load %arg7[%c1_75, %c0_76, %c0_77] : memref<4x32x16xf32, #tpu.memory_space<vmem>>, vector<1x32x16xf32>
    %69 = vector.shape_cast %68 : vector<1x32x16xf32> to vector<32x16xf32>
    %cst_78 = arith.constant dense<0.000000e+00> : vector<32x256xf32>
    %70 = tpu.matmul %69, %67, %cst_78 {dimension_numbers = #tpu.dot_dimension_numbers<[1], [0], [0], [1], [0, 0, 1, 1], [], []>} : vector<32x16xf32>, vector<16x256xf32>, vector<32x256xf32> -> vector<32x256xf32>
    %71 = arith.addf %64, %70 : vector<32x256xf32>
    %c2_79 = arith.constant 2 : index
    %c0_80 = arith.constant 0 : index
    %c0_81 = arith.constant 0 : index
    %72 = vector.load %arg6[%c2_79, %c0_80, %c0_81] : memref<4x64x256xf32, #tpu.memory_space<vmem>>, vector<1x64x256xf32>
    %73 = vector.shape_cast %72 : vector<1x64x256xf32> to vector<64x256xf32>
    %cst_82 = arith.constant dense<0.000000e+00> : vector<16x256xf32>
    %74 = tpu.matmul %58, %73, %cst_82 {dimension_numbers = #tpu.dot_dimension_numbers<[1], [0], [0], [1], [0, 0, 1, 1], [], []>} : vector<16x64xf32>, vector<64x256xf32>, vector<16x256xf32> -> vector<16x256xf32>
    %c2_83 = arith.constant 2 : index
    %c0_84 = arith.constant 0 : index
    %c0_85 = arith.constant 0 : index
    %75 = vector.load %arg7[%c2_83, %c0_84, %c0_85] : memref<4x32x16xf32, #tpu.memory_space<vmem>>, vector<1x32x16xf32>
    %76 = vector.shape_cast %75 : vector<1x32x16xf32> to vector<32x16xf32>
    %cst_86 = arith.constant dense<0.000000e+00> : vector<32x256xf32>
    %77 = tpu.matmul %76, %74, %cst_86 {dimension_numbers = #tpu.dot_dimension_numbers<[1], [0], [0], [1], [0, 0, 1, 1], [], []>} : vector<32x16xf32>, vector<16x256xf32>, vector<32x256xf32> -> vector<32x256xf32>
    %78 = arith.addf %71, %77 : vector<32x256xf32>
    %c3_87 = arith.constant 3 : index
    %c0_88 = arith.constant 0 : index
    %c0_89 = arith.constant 0 : index
    %79 = vector.load %arg6[%c3_87, %c0_88, %c0_89] : memref<4x64x256xf32, #tpu.memory_space<vmem>>, vector<1x64x256xf32>
    %80 = vector.shape_cast %79 : vector<1x64x256xf32> to vector<64x256xf32>
    %cst_90 = arith.constant dense<0.000000e+00> : vector<16x256xf32>
    %81 = tpu.matmul %58, %80, %cst_90 {dimension_numbers = #tpu.dot_dimension_numbers<[1], [0], [0], [1], [0, 0, 1, 1], [], []>} : vector<16x64xf32>, vector<64x256xf32>, vector<16x256xf32> -> vector<16x256xf32>
    %c3_91 = arith.constant 3 : index
    %c0_92 = arith.constant 0 : index
    %c0_93 = arith.constant 0 : index
    %82 = vector.load %arg7[%c3_91, %c0_92, %c0_93] : memref<4x32x16xf32, #tpu.memory_space<vmem>>, vector<1x32x16xf32>
    %83 = vector.shape_cast %82 : vector<1x32x16xf32> to vector<32x16xf32>
    %cst_94 = arith.constant dense<0.000000e+00> : vector<32x256xf32>
    %84 = tpu.matmul %83, %81, %cst_94 {dimension_numbers = #tpu.dot_dimension_numbers<[1], [0], [0], [1], [0, 0, 1, 1], [], []>} : vector<32x16xf32>, vector<16x256xf32>, vector<32x256xf32> -> vector<32x256xf32>
    %85 = arith.addf %78, %84 : vector<32x256xf32>
    %cst_95 = arith.constant 0.000000e+00 : f32
    %86 = vector.broadcast %cst_95 : f32 to vector<32x256xf32>
    %87 = arith.maximumf %85, %86 : vector<32x256xf32>
    %c0_96 = arith.constant 0 : index
    %c0_97 = arith.constant 0 : index
    %c0_98 = arith.constant 0 : index
    %88 = vector.load %arg8[%c0_96, %c0_97, %c0_98] : memref<2x256x90xf32, #tpu.memory_space<vmem>>, vector<1x256x90xf32>
    %89 = vector.shape_cast %88 : vector<1x256x90xf32> to vector<256x90xf32>
    %cst_99 = arith.constant dense<0.000000e+00> : vector<32x90xf32>
    %90 = tpu.matmul %87, %89, %cst_99 {dimension_numbers = #tpu.dot_dimension_numbers<[1], [0], [0], [1], [0, 0, 1, 1], [], []>} : vector<32x256xf32>, vector<256x90xf32>, vector<32x90xf32> -> vector<32x90xf32>
    %c0_100 = arith.constant 0 : index
    %c0_101 = arith.constant 0 : index
    %c0_102 = arith.constant 0 : index
    %91 = vector.load %arg9[%c0_100, %c0_101, %c0_102] : memref<2x60x32xf32, #tpu.memory_space<vmem>>, vector<1x60x32xf32>
    %92 = vector.shape_cast %91 : vector<1x60x32xf32> to vector<60x32xf32>
    %cst_103 = arith.constant dense<0.000000e+00> : vector<60x90xf32>
    %93 = tpu.matmul %92, %90, %cst_103 {dimension_numbers = #tpu.dot_dimension_numbers<[1], [0], [0], [1], [0, 0, 1, 1], [], []>} : vector<60x32xf32>, vector<32x90xf32>, vector<60x90xf32> -> vector<60x90xf32>
    %c1_104 = arith.constant 1 : index
    %c0_105 = arith.constant 0 : index
    %c0_106 = arith.constant 0 : index
    %94 = vector.load %arg8[%c1_104, %c0_105, %c0_106] : memref<2x256x90xf32, #tpu.memory_space<vmem>>, vector<1x256x90xf32>
    %95 = vector.shape_cast %94 : vector<1x256x90xf32> to vector<256x90xf32>
    %cst_107 = arith.constant dense<0.000000e+00> : vector<32x90xf32>
    %96 = tpu.matmul %87, %95, %cst_107 {dimension_numbers = #tpu.dot_dimension_numbers<[1], [0], [0], [1], [0, 0, 1, 1], [], []>} : vector<32x256xf32>, vector<256x90xf32>, vector<32x90xf32> -> vector<32x90xf32>
    %c1_108 = arith.constant 1 : index
    %c0_109 = arith.constant 0 : index
    %c0_110 = arith.constant 0 : index
    %97 = vector.load %arg9[%c1_108, %c0_109, %c0_110] : memref<2x60x32xf32, #tpu.memory_space<vmem>>, vector<1x60x32xf32>
    %98 = vector.shape_cast %97 : vector<1x60x32xf32> to vector<60x32xf32>
    %cst_111 = arith.constant dense<0.000000e+00> : vector<60x90xf32>
    %99 = tpu.matmul %98, %96, %cst_111 {dimension_numbers = #tpu.dot_dimension_numbers<[1], [0], [0], [1], [0, 0, 1, 1], [], []>} : vector<60x32xf32>, vector<32x90xf32>, vector<60x90xf32> -> vector<60x90xf32>
    %100 = arith.addf %93, %99 : vector<60x90xf32>
    %cst_112 = arith.constant 0.000000e+00 : f32
    %101 = vector.broadcast %cst_112 : f32 to vector<60x90xf32>
    %102 = arith.maximumf %100, %101 : vector<60x90xf32>
    %c0_113 = arith.constant 0 : index
    %c0_114 = arith.constant 0 : index
    %103 = vector.load %arg10[%c0_113, %c0_114] : memref<60x90xf32, #tpu.memory_space<vmem>>, vector<60x90xf32>
    tpu.vector_store %arg10[%c0_113, %c0_114], %102 {strides = array<i32>} : memref<60x90xf32, #tpu.memory_space<vmem>>, vector<60x90xf32>,
    return
  }
  func.func @transform_0(%arg0: i32) -> (i32, i32) {
    %c0_i32 = arith.constant 0 : i32
    %c0_i32_0 = arith.constant 0 : i32
    %c0_i32_1 = arith.constant 0 : i32
    return %c0_i32, %c0_i32_0 : i32, i32
  }
  func.func @transform_1(%arg0: i32) -> (i32, i32, i32) {
    %c0_i32 = arith.constant 0 : i32
    %c0_i32_0 = arith.constant 0 : i32
    %c0_i32_1 = arith.constant 0 : i32
    %c0_i32_2 = arith.constant 0 : i32
    return %c0_i32, %c0_i32_0, %c0_i32_1 : i32, i32, i32
  }
  func.func @transform_2(%arg0: i32) -> (i32, i32, i32) {
    %c0_i32 = arith.constant 0 : i32
    %c0_i32_0 = arith.constant 0 : i32
    %c0_i32_1 = arith.constant 0 : i32
    %c0_i32_2 = arith.constant 0 : i32
    return %c0_i32, %c0_i32_0, %c0_i32_1 : i32, i32, i32
  }
  func.func @transform_3(%arg0: i32) -> (i32, i32, i32) {
    %c0_i32 = arith.constant 0 : i32
    %c0_i32_0 = arith.constant 0 : i32
    %c0_i32_1 = arith.constant 0 : i32
    %c0_i32_2 = arith.constant 0 : i32
    return %c0_i32, %c0_i32_0, %c0_i32_1 : i32, i32, i32
  }
  func.func @transform_4(%arg0: i32) -> (i32, i32, i32) {
    %c0_i32 = arith.constant 0 : i32
    %c0_i32_0 = arith.constant 0 : i32
    %c0_i32_1 = arith.constant 0 : i32
    %c0_i32_2 = arith.constant 0 : i32
    return %c0_i32, %c0_i32_0, %c0_i32_1 : i32, i32, i32
  }
  func.func @transform_5(%arg0: i32) -> (i32, i32, i32) {
    %c0_i32 = arith.constant 0 : i32
    %c0_i32_0 = arith.constant 0 : i32
    %c0_i32_1 = arith.constant 0 : i32
    %c0_i32_2 = arith.constant 0 : i32
    return %c0_i32, %c0_i32_0, %c0_i32_1 : i32, i32, i32
  }
  func.func @transform_6(%arg0: i32) -> (i32, i32, i32) {
    %c0_i32 = arith.constant 0 : i32
    %c0_i32_0 = arith.constant 0 : i32
    %c0_i32_1 = arith.constant 0 : i32
    %c0_i32_2 = arith.constant 0 : i32
    return %c0_i32, %c0_i32_0, %c0_i32_1 : i32, i32, i32
  }
  func.func @transform_7(%arg0: i32) -> (i32, i32, i32) {
    %c0_i32 = arith.constant 0 : i32
    %c0_i32_0 = arith.constant 0 : i32
    %c0_i32_1 = arith.constant 0 : i32
    %c0_i32_2 = arith.constant 0 : i32
    return %c0_i32, %c0_i32_0, %c0_i32_1 : i32, i32, i32
  }
  func.func @transform_8(%arg0: i32) -> (i32, i32, i32) {
    %c0_i32 = arith.constant 0 : i32
    %c0_i32_0 = arith.constant 0 : i32
    %c0_i32_1 = arith.constant 0 : i32
    %c0_i32_2 = arith.constant 0 : i32
    return %c0_i32, %c0_i32_0, %c0_i32_1 : i32, i32, i32
  }
  func.func @transform_9(%arg0: i32) -> (i32, i32) {
    %c0_i32 = arith.constant 0 : i32
    %c0_i32_0 = arith.constant 0 : i32
    %c0_i32_1 = arith.constant 0 : i32
    return %c0_i32, %c0_i32_0 : i32, i32
  }
}

</mosaic_0001>

<bundles_post_ra>
// kernel: _forward.1
= control target key start
LH: loop header
LB: loop body
LE: loop exit
PB: predicated region body
PF: predicated region fallthrough
CT: control target
= control target key end

     0   :  { %vm34_vm0 = vcmask 64512   ;;  %v3469_v0 = vmov 0.0   ;;  %vm3470_vm1 = vmmov 0   ;;  %v3471_v6 = vmov 0.0|0.0   ;;  %s4352_s1 = inlined_call_operand.vmem [shape: f32[4,8,64], index: 1, kind: input, shape index: {}]   ;;  %s4353_s0 = inlined_call_operand.vmem [shape: f32[2,8], index: 0, kind: input, shape index: {}]   ;;  %s4354_s3 = inlined_call_operand.vmem [shape: f32[4,64,64], index: 3, kind: input, shape index: {}]   ;;  %s4355_s2 = inlined_call_operand.vmem [shape: f32[4,8,2], index: 2, kind: input, shape index: {}]   ;;  %s4356_s4 = inlined_call_operand.vmem [shape: f32[4,16,8], index: 4, kind: input, shape index: {}]   ;;  %s4357_s5 = inlined_call_operand.vmem [shape: f32[4,64,256], index: 5, kind: input, shape index: {}]   ;;  %s4358_s6 = inlined_call_operand.vmem [shape: f32[4,32,16], index: 6, kind: input, shape index: {}]   ;;  %s4359_s7 = inlined_call_operand.vmem [shape: f32[2,256,90], index: 7, kind: input, shape index: {}]   ;;  %s4360_s8 = inlined_call_operand.vmem [shape: f32[2,60,32], index: 8, kind: input, shape index: {}]   ;;  %s4361_s9 = inlined_call_operand.vmem [shape: f32[60,90], index: 9, kind: output, shape index: {}]  }
   0x1   :  { %3038 = vmatprep.subr.mxu1 %v3469_v0  ;;  %v33_v1 = vld [vmem:[%s4352_s1] sm:$0xff]  ;;  %3040 = vmatprep.mubr.msk.f32.mxu1 %vm3470_vm1, %v3469_v0  ;;  %v2663_v3 = vld [vmem:[%s4352_s1 + $0x8] sm:$0xff]  ;;  %v2670_v4 = vld [vmem:[%s4352_s1 + $0x10] sm:$0xff]  ;;  %vm187_vm2 = vcmask 1041408   ;;  %vm183_vm3 = vcmask 15360   ;;  %vm648_vm4 = vcmask 523264  }
   0x2   :  { %v32_v2 = vld [vmem:[%s4353_s0] sm:$0x3]  ;;  %3039 = vmatpush3.msra.mxu1 %v33_v1  ;;  %3048 = vmatprep.subr.mxu0 %v3469_v0  ;;  %v2675_v5 = vld [vmem:[%s4352_s1 + $0x18] sm:$0xff]  ;;  %v641_v8 = vld [vmem:[%s4354_s3 + $0x8] sm:$0xff]  ;;  %vm1502_vm5 = vcmask 130048   ;;  %vm2381_vm6 = vcmask 261120  }
   0x3   :  { %3041 = vmatmul.mubr.msk.f32.vlgmr.msra.gmra.mrb[0].mxu1 %vm34_vm0, %v32_v2  ;;  %3043 = vmatprep.subr.mxu1 %v3469_v0  ;;  %v640_v7 = vld [vmem:[%s4354_s3] sm:$0xff]  ;;  %v642_v10 = vld [vmem:[%s4354_s3 + $0x10] sm:$0xff]  ;;  %v643_v11 = vld [vmem:[%s4354_s3 + $0x18] sm:$0xff]  ;;  %vm2648_vm7 = vcmask 736256   ;;  %vm2656_vm8 = vcmask 732160  }
   0x4   :  { %3044 = vmatpush3.msra.mxu1 %v2663_v3  ;;  %3045 = vmatprep.mubr.msk.f32.mxu1 %vm3470_vm1, %v3469_v0  ;;  %v3215_v9 = vpack.c.bf16 %v641_v8, %v640_v7  ;;  %v3218_v12 = vpack.c.bf16 %v643_v11, %v642_v10  ;;  %v644_v13 = vld [vmem:[%s4354_s3 + $0x20] sm:$0xff]  ;;  %v645_v14 = vld [vmem:[%s4354_s3 + $0x28] sm:$0xff]  ;;  %v2672_v26 = vld [vmem:[%s4355_s2 + $0x10] sm:$0xff] }
   0x5   :  { %3058 = vmatprep.subr.mxu1 %v3469_v0  ;;  %3050 = vmatprep.mubr.msk.f32.mxu0 %vm3470_vm1, %v3469_v0  ;;  %v3221_v15 = vpack.c.bf16 %v645_v14, %v644_v13  ;;  %v2665_v18 = vld [vmem:[%s4355_s2 + $0x8] sm:$0xff]  ;;  %v108_v23 = vld [vmem:[%s4355_s2] sm:$0xff]  ;;  %v2677_v29 = vld [vmem:[%s4355_s2 + $0x18] sm:$0xff] }
   0x6   :  { %v2681_v27 = vld [vmem:[%s4354_s3 + $0x40] sm:$0xff]  ;;  %v2682_v28 = vld [vmem:[%s4354_s3 + $0x48] sm:$0xff]  ;;  %v2683_v31 = vld [vmem:[%s4354_s3 + $0x50] sm:$0xff] }
   0x7   :  { %3046 = vmatmul.mubr.msk.f32.vlgmr.msra.gmra.mrb[2].mxu1 %vm34_vm0, %v32_v2  ;;  %v3227_v30 = vpack.c.bf16 %v2682_v28, %v2681_v27  ;;  %v2684_v32 = vld [vmem:[%s4354_s3 + $0x58] sm:$0xff]  ;;  %v2685_v34 = vld [vmem:[%s4354_s3 + $0x60] sm:$0xff]  ;;  %v2686_v35 = vld [vmem:[%s4354_s3 + $0x68] sm:$0xff] }
   0x8   :  { %3059 = vmatpush3.msra.mxu1 %v2670_v4  ;;  %3060 = vmatprep.mubr.msk.f32.mxu1 %vm3470_vm1, %v3469_v0  ;;  %v3230_v33 = vpack.c.bf16 %v2684_v32, %v2683_v31  ;;  %v3233_v36 = vpack.c.bf16 %v2686_v35, %v2685_v34  ;;  %v2687_v37 = vld [vmem:[%s4354_s3 + $0x70] sm:$0xff]  ;;  %v2688_v38 = vld [vmem:[%s4354_s3 + $0x78] sm:$0xff]  ;;  %v2696_v43 = vld [vmem:[%s4354_s3 + $0x80] sm:$0xff] }
   0x9   :  { %3068 = vmatprep.subr.mxu1 %v3469_v0  ;;  %v3236_v39 = vpack.c.bf16 %v2688_v38, %v2687_v37  ;;  %v646_v40 = vld [vmem:[%s4354_s3 + $0x30] sm:$0xff]  ;;  %v647_v41 = vld [vmem:[%s4354_s3 + $0x38] sm:$0xff]  ;;  %v2697_v44 = vld [vmem:[%s4354_s3 + $0x88] sm:$0xff] }
   0xa   :  { %v3224_v42 = vpack.c.bf16 %v647_v41, %v646_v40  ;;  %v3239_v46 = vpack.c.bf16 %v2697_v44, %v2696_v43  ;;  %v2698_v49 = vld [vmem:[%s4354_s3 + $0x90] sm:$0xff]  ;;  %v2699_v50 = vld [vmem:[%s4354_s3 + $0x98] sm:$0xff]  ;;  %v2700_v52 = vld [vmem:[%s4354_s3 + $0xa0] sm:$0xff] }
   0xb   :  { %3061 = vmatmul.mubr.msk.f32.vlgmr.msra.gmra.mrb[4].mxu1 %vm34_vm0, %v32_v2  ;;  %v3242_v51 = vpack.c.bf16 %v2699_v50, %v2698_v49  ;;  %v2701_v53 = vld [vmem:[%s4354_s3 + $0xa8] sm:$0xff]  ;;  %v2702_v55 = vld [vmem:[%s4354_s3 + $0xb0] sm:$0xff]  ;;  %v2703_v56 = vld [vmem:[%s4354_s3 + $0xb8] sm:$0xff] }
   0xc   :  { %3069 = vmatpush3.msra.mxu1 %v2675_v5  ;;  %3070 = vmatprep.mubr.msk.f32.mxu1 %vm3470_vm1, %v3469_v0  ;;  %v3245_v54 = vpack.c.bf16 %v2701_v53, %v2700_v52  ;;  %v3248_v57 = vpack.c.bf16 %v2703_v56, %v2702_v55  ;;  %v2690_v58 = vld [vmem:[%s4356_s4 + $0x10] sm:$0xff]  ;;  %v2691_v61 = vld [vmem:[%s4356_s4 + $0x18] sm:$0xff]  ;;  %v722_v1 = vld [vmem:[%s4356_s4] sm:$0xff] }
   0xd   :  { %3214 = vmatprep.subr.bf16.mxu1 %v3471_v6  ;;  %v2705_v3 = vld [vmem:[%s4356_s4 + $0x20] sm:$0xff]  ;;  %v2710_v5 = vld [vmem:[%s4354_s3 + $0xc8] sm:$0xff]  ;;  %v2711_v11 = vld [vmem:[%s4354_s3 + $0xd0] sm:$0xff] }
   0xe   :  { %v2709_v4 = vld [vmem:[%s4354_s3 + $0xc0] sm:$0xff]  ;;  %v2706_v8 = vld [vmem:[%s4356_s4 + $0x28] sm:$0xff]  ;;  %v1307_v27 = vld [vmem:[%s4357_s5 + $0x38] sm:$0xff] }
   0xf   :  { %3071 = vmatmul.mubr.msk.f32.vlgmr.msra.gmra.mrb[6].mxu1 %vm34_vm0, %v32_v2  ;;  %v723_v2 = vld [vmem:[%s4356_s4 + $0x8] sm:$0xff]  ;;  %v2713_v14 = vld [vmem:[%s4354_s3 + $0xe0] sm:$0xff]  ;;  %v2726_v41 = vld [vmem:[%s4357_s5 + $0x90] sm:$0xff] }
  0x10   :  { %3094 = vmatprep.mubr.msk.f32.mxu1 %vm3470_vm1, %v3469_v0  ;;  %3216 = vmatpush3.bf16.msra.mxu1 %v3215_v9  ;;  %v3251_v9 = vpack.c.bf16 %v2710_v5, %v2709_v4  ;;  %v1309_v32 = vld [vmem:[%s4357_s5 + $0x48] sm:$0xff]  ;;  %v1308_v35 = vld [vmem:[%s4357_s5 + $0x40] sm:$0xff]  ;;  %v2731_v43 = vld [vmem:[%s4357_s5 + $0xb8] sm:$0xff] }
  0x11   :  { %3217 = vmatprep.subr.bf16.mxu1 %v3471_v6  ;;  %v2725_v38 = vld [vmem:[%s4357_s5 + $0x88] sm:$0xff]  ;;  %v2724_v40 = vld [vmem:[%s4357_s5 + $0x80] sm:$0xff]  ;;  %v2735_v53 = vld [vmem:[%s4357_s5 + $0xd8] sm:$0xff] }
  0x12   :  { %v2728_v50 = vld [vmem:[%s4357_s5 + $0xa0] sm:$0xff]  ;;  %v2733_v52 = vld [vmem:[%s4357_s5 + $0xc8] sm:$0xff]  ;;  %v1314_v5 = vld [vmem:[%s4357_s5 + $0x70] sm:$0xff] }
  0x13   :  { %v3286_v55 = vpack.c.bf16 %v2735_v53, %v2733_v52  ;;  %v2732_v56 = vld [vmem:[%s4357_s5 + $0xc0] sm:$0xff]  ;;  %v2743_v52 = vld [vmem:[%s4358_s6 + $0x28] sm:$0xff] }
  0x14   :  { %3219 = vmatpush3.bf16.msra.mxu1 %v3218_v12  ;;  %v2712_v12 = vld [vmem:[%s4354_s3 + $0xd8] sm:$0xff]  ;;  %v1312_v4 = vld [vmem:[%s4357_s5 + $0x60] sm:$0xff] }
  0x15   :  { %3220 = vmatprep.subr.bf16.mxu1 %v3471_v6  ;;  %v3254_v13 = vpack.c.bf16 %v2712_v12, %v2711_v11  ;;  %v2780_v12 = vld [vmem:[%s4357_s5 + $0x180] sm:$0xff] }
  0x18   :  { %3222 = vmatpush3.bf16.msra.mxu1 %v3221_v15  ;;  %v2714_v15 = vld [vmem:[%s4354_s3 + $0xe8] sm:$0xff] }
  0x19   :  { %3223 = vmatprep.subr.bf16.mxu1 %v3471_v6 }
  0x1c   :  { %3225 = vmatpush3.bf16.msra.mxu1 %v3224_v42  ;;  %v2729_v42 = vld [vmem:[%s4357_s5 + $0xa8] sm:$0xff] }
  0x1d   :  { %v3282_v49 = vpack.c.bf16 %v2731_v43, %v2729_v42 }
  0xd6   :  { %v104_v16 = vpop.f32.mrb[0].mxu1 }
  0xd7   :  { %v3042_v17 = vpop.f32.mrb[1].mxu1 }
  0xd8   :  { %v2715_v17 = vld [vmem:[%s4354_s3 + $0xf0] sm:$0xff] }
  0xda   :  { %v177_v19 = vpop.f32.mrb[2].mxu1 }
  0xdb   :  { %v3047_v20 = vpop.f32.mrb[3].mxu1  ;;  %3049 = vmatpush3.msk.msra.mxu0 %vm187_vm2, %v177_v19 }
  0xdc   :  { %3051 = vmatmul.mubr.msk.f32.vlgmr.msra.gmra.mrb[0].mxu0 %vm183_vm3, %v2665_v18  ;;  %3053 = vmatprep.subr.mxu0 %v3469_v0  ;;  %v2716_v18 = vld [vmem:[%s4354_s3 + $0xf8] sm:$0xff]  ;;  %v2718_v20 = vld [vmem:[%s4356_s4 + $0x30] sm:$0xff] }
  0xdd   :  { %3054 = vmatpush3.msk.msra.mxu0 %vm187_vm2, %v104_v16  ;;  %3055 = vmatprep.mubr.msk.f32.mxu0 %vm3470_vm1, %v3469_v0  ;;  %v3257_v16 = vpack.c.bf16 %v2714_v15, %v2713_v14  ;;  %v3260_v19 = vpack.c.bf16 %v2716_v18, %v2715_v17  ;;  %v2785_v14 = vld [vmem:[%s4357_s5 + $0x1a8] sm:$0xff]  ;;  %v2787_v15 = vld [vmem:[%s4357_s5 + $0x1b8] sm:$0xff] }
  0xde   :  { %v405_v21 = vpop.f32.mrb[4].mxu1  ;;  %3063 = vmatprep.subr.mxu0 %v3469_v0 }
  0xdf   :  { %v3062_v22 = vpop.f32.mrb[5].mxu1 }
  0xe0   :  { %v1303_v22 = vld [vmem:[%s4357_s5 + $0x18] sm:$0xff] }
  0xe2   :  { %v556_v24 = vpop.f32.mrb[6].mxu1 }
  0xe3   :  { %v3072_v25 = vpop.f32.mrb[7].mxu1 }
  0xe4   :  { %3056 = vmatmul.mubr.msk.f32.vlgmr.msra.gmra.mrb[0].mxu0 %vm183_vm3, %v108_v23 }
  0xe5   :  { %3064 = vmatpush3.msk.msra.mxu0 %vm187_vm2, %v405_v21  ;;  %3065 = vmatprep.mubr.msk.f32.mxu0 %vm3470_vm1, %v3469_v0  ;;  %v1301_v21 = vld [vmem:[%s4357_s5 + $0x8] sm:$0xff] }
  0xe6   :  { %3073 = vmatprep.subr.mxu0 %v3469_v0  ;;  %v3262_v23 = vpack.c.bf16 %v1303_v22, %v1301_v21  ;;  %v2784_v21 = vld [vmem:[%s4357_s5 + $0x1a0] sm:$0xff]  ;;  %v2786_v22 = vld [vmem:[%s4357_s5 + $0x1b0] sm:$0xff] }
  0xec   :  { %3066 = vmatmul.mubr.msk.f32.vlgmr.msra.gmra.mrb[0].mxu0 %vm183_vm3, %v2672_v26  ;;  %v1305_v26 = vld [vmem:[%s4357_s5 + $0x28] sm:$0xff] }
  0xed   :  { %3074 = vmatpush3.msk.msra.mxu0 %vm187_vm2, %v556_v24  ;;  %3075 = vmatprep.mubr.msk.f32.mxu0 %vm3470_vm1, %v3469_v0  ;;  %v1302_v24 = vld [vmem:[%s4357_s5 + $0x10] sm:$0xff]  ;;  %v3266_v28 = vpack.c.bf16 %v1307_v27, %v1305_v26  ;;  %v2788_v27 = vld [vmem:[%s4357_s5 + $0x1c0] sm:$0xff] }
  0xee   :  { %3226 = vmatprep.subr.bf16.mxu0 %v3471_v6 }
  0xf4   :  { %3076 = vmatmul.mubr.msk.f32.vlgmr.msra.gmra.mrb[0].mxu0 %vm183_vm3, %v2677_v29  ;;  %v1304_v29 = vld [vmem:[%s4357_s5 + $0x20] sm:$0xff] }
  0xf5   :  { %3228 = vmatpush3.bf16.msra.mxu0 %v3227_v30  ;;  %3113 = vmatprep.mubr.msk.f32.mxu0 %vm3470_vm1, %v3469_v0  ;;  %v1306_v30 = vld [vmem:[%s4357_s5 + $0x30] sm:$0xff] }
  0xf6   :  { %3229 = vmatprep.subr.bf16.mxu0 %v3471_v6  ;;  %v3268_v31 = vpack.c.bf16 %v1306_v30, %v1304_v29  ;;  %v2793_v29 = vld [vmem:[%s4357_s5 + $0x1e8] sm:$0xff]  ;;  %v2795_v30 = vld [vmem:[%s4357_s5 + $0x1f8] sm:$0xff] }
  0xf9   :  { %3231 = vmatpush3.bf16.msra.mxu0 %v3230_v33  ;;  %v1311_v33 = vld [vmem:[%s4357_s5 + $0x58] sm:$0xff] }
  0xfa   :  { %3232 = vmatprep.subr.bf16.mxu0 %v3471_v6  ;;  %v3270_v34 = vpack.c.bf16 %v1311_v33, %v1309_v32  ;;  %v3334_v32 = vpack.c.bf16 %v2795_v30, %v2793_v29  ;;  %v2792_v33 = vld [vmem:[%s4357_s5 + $0x1e0] sm:$0xff]  ;;  %v2147_v29 = vld [vmem:[%s4359_s7 + $0x90] sm:$0xff]  ;;  %v2148_v30 = vld [vmem:[%s4359_s7 + $0x98] sm:$0xff] }
  0xfd   :  { %3234 = vmatpush3.bf16.msra.mxu0 %v3233_v36  ;;  %v1310_v36 = vld [vmem:[%s4357_s5 + $0x50] sm:$0xff] }
  0xfe   :  { %3235 = vmatprep.subr.bf16.mxu0 %v3471_v6  ;;  %v3272_v37 = vpack.c.bf16 %v1310_v36, %v1308_v35 }
 0x101   :  { %3237 = vmatpush3.bf16.msra.mxu0 %v3236_v39  ;;  %v2727_v39 = vld [vmem:[%s4357_s5 + $0x98] sm:$0xff] }
 0x102   :  { %3238 = vmatprep.subr.bf16.mxu0 %v3471_v6  ;;  %v3278_v44 = vpack.c.bf16 %v2727_v39, %v2725_v38 }
 0x1c7   :  { %v634_v45 = vpop.f32.mrb[0].mxu0 }
 0x1c8   :  { %v3652_v47 = vmax.f32 %v634_v45, 0.0  ;;  %v3077_v48 = vpop.f32.mrb[1].mxu0 }
 0x1ca   :  { %3095 = vmatmul.mubr.msk.f32.vlgmr.msra.gmra.mrb[8].mxu1 %vm648_vm4, %v3652_v47  ;;  %3114 = vmatmul.mubr.msk.f32.vlgmr.msra.gmra.mrb[2].mxu0 %vm648_vm4, %v3652_v47 }
 0x1cb   :  { %3240 = vmatpush3.bf16.msra.mxu0 %v3239_v46  ;;  %3142 = vmatprep.mubr.msk.f32.mxu0 %vm3470_vm1, %v3469_v0  ;;  %v2719_v46 = vld [vmem:[%s4356_s4 + $0x38] sm:$0xff] }
 0x1cc   :  { %3241 = vmatprep.subr.bf16.mxu0 %v3471_v6  ;;  %3118 = vmatprep.mubr.msk.f32.mxu1 %vm34_vm0, %v2690_v58  ;;  %v2737_v58 = vld [vmem:[%s4357_s5 + $0xe8] sm:$0xff] }
 0x1cf   :  { %3243 = vmatpush3.bf16.msra.mxu0 %v3242_v51  ;;  %v2730_v51 = vld [vmem:[%s4357_s5 + $0xb0] sm:$0xff] }
 0x1d0   :  { %3244 = vmatprep.subr.bf16.mxu0 %v3471_v6 }
 0x1d3   :  { %3246 = vmatpush3.bf16.msra.mxu0 %v3245_v54  ;;  %v3284_v54 = vpack.c.bf16 %v2730_v51, %v2728_v50  ;;  %v2742_v50 = vld [vmem:[%s4358_s6 + $0x20] sm:$0xff] }
 0x1d4   :  { %3247 = vmatprep.subr.bf16.mxu0 %v3471_v6 }
 0x1d7   :  { %3249 = vmatpush3.bf16.msra.mxu0 %v3248_v57  ;;  %v2734_v57 = vld [vmem:[%s4357_s5 + $0xd0] sm:$0xff] }
 0x1d8   :  { %3263 = vmatprep.subr.bf16.mxu0 %v3262_v23  ;;  %v2789_v23 = vld [vmem:[%s4357_s5 + $0x1c8] sm:$0xff] }
 0x1da   :  { %3143 = vmatmul.mubr.msk.f32.vlgmr.msra.gmra.mrb[4].mxu0 %vm648_vm4, %v3652_v47 }
 0x1db   :  { %1386 = vmatprep.mubr.f32.mxu0 %v3469_v0 }
 0x29d   :  { %v718_v59 = vpop.f32.mrb[8].mxu1  ;;  %v799_v60 = vpop.f32.mrb[2].mxu0 }
 0x29e   :  { %v3096_v62 = vpop.f32.mrb[9].mxu1  ;;  %v3115_v63 = vpop.f32.mrb[3].mxu0  ;;  %3116 = vmatprep.subr.mxu1 %v799_v60 }
 0x29f   :  { %3117 = vmatpush3.msra.mxu1 %v799_v60  ;;  %v3288_v60 = vpack.c.bf16 %v2734_v57, %v2732_v56  ;;  %v1313_v62 = vld [vmem:[%s4357_s5 + $0x68] sm:$0xff]  ;;  %v1315_v63 = vld [vmem:[%s4357_s5 + $0x78] sm:$0xff] }
 0x2a0   :  { %3119 = vmatmul.mubr.msk.f32.vlgmr.msra.gmra.mrb[10].mxu1 %vm34_vm0, %v2691_v61  ;;  %3121 = vmatprep.subr.mxu1 %v718_v59 }
 0x2a1   :  { %3122 = vmatpush3.msra.mxu1 %v718_v59  ;;  %3123 = vmatprep.mubr.msk.f32.mxu1 %vm34_vm0, %v722_v1  ;;  %v2739_v59 = vld [vmem:[%s4357_s5 + $0xf8] sm:$0xff]  ;;  %v2736_v1 = vld [vmem:[%s4357_s5 + $0xe0] sm:$0xff] }
 0x2a2   :  { %v3290_v61 = vpack.c.bf16 %v2739_v59, %v2737_v58  ;;  %v2745_v59 = vld [vmem:[%s4358_s6 + $0x38] sm:$0xff] }
 0x2a8   :  { %3124 = vmatmul.mubr.msk.f32.vlgmr.msra.gmra.mrb[10].mxu1 %vm34_vm0, %v723_v2  ;;  %v3274_v2 = vpack.c.bf16 %v1315_v63, %v1313_v62  ;;  %v2756_v62 = vld [vmem:[%s4357_s5 + $0x110] sm:$0xff]  ;;  %v2759_v63 = vld [vmem:[%s4357_s5 + $0x128] sm:$0xff] }
 0x2a9   :  { %3147 = vmatprep.mubr.msk.f32.mxu1 %vm34_vm0, %v2705_v3  ;;  %v2738_v3 = vld [vmem:[%s4357_s5 + $0xf0] sm:$0xff] }
 0x2ad   :  { %v1043_v7 = vpop.f32.mrb[4].mxu0 }
 0x2ae   :  { %v3144_v10 = vpop.f32.mrb[5].mxu0  ;;  %3145 = vmatprep.subr.mxu1 %v1043_v7 }
 0x2af   :  { %3146 = vmatpush3.msra.mxu1 %v1043_v7  ;;  %v3292_v7 = vpack.c.bf16 %v2738_v3, %v2736_v1  ;;  %v2783_v10 = vld [vmem:[%s4357_s5 + $0x198] sm:$0xff] }
 0x2b0   :  { %3250 = vmatprep.subr.bf16.mxu1 %v3471_v6  ;;  %3148 = vmatmul.mubr.msk.f32.vlgmr.msra.gmra.mrb[10].mxu1 %vm34_vm0, %v2706_v8  ;;  %v3276_v8 = vpack.c.bf16 %v1314_v5, %v1312_v4  ;;  %v2761_v1 = vld [vmem:[%s4357_s5 + $0x138] sm:$0xff]  ;;  %v2758_v5 = vld [vmem:[%s4357_s5 + $0x120] sm:$0xff] }
 0x2b1   :  { %3252 = vmatpush3.bf16.msra.mxu1 %v3251_v9  ;;  %3166 = vmatprep.mubr.msk.f32.mxu1 %vm3470_vm1, %v3469_v0  ;;  %v2781_v9 = vld [vmem:[%s4357_s5 + $0x188] sm:$0xff]  ;;  %v3306_v4 = vpack.c.bf16 %v2761_v1, %v2759_v63  ;;  %v2140_v63 = vld [vmem:[%s4359_s7 + $0x58] sm:$0xff]  ;;  %v2157_v1 = vld [vmem:[%s4359_s7 + $0xe0] sm:$0xff] }
 0x2b2   :  { %3253 = vmatprep.subr.bf16.mxu1 %v3471_v6  ;;  %v3322_v11 = vpack.c.bf16 %v2783_v10, %v2781_v9  ;;  %v2765_v9 = vld [vmem:[%s4357_s5 + $0x158] sm:$0xff]  ;;  %v1400_v10 = vld [vmem:[%s4358_s6 + $0x8] sm:$0xff] }
 0x2b5   :  { %3255 = vmatpush3.bf16.msra.mxu1 %v3254_v13  ;;  %v2782_v13 = vld [vmem:[%s4357_s5 + $0x190] sm:$0xff] }
 0x2b6   :  { %3256 = vmatprep.subr.bf16.mxu1 %v3471_v6  ;;  %v3324_v18 = vpack.c.bf16 %v2782_v13, %v2780_v12  ;;  %v2762_v13 = vld [vmem:[%s4357_s5 + $0x140] sm:$0xff] }
 0x2b9   :  { %3258 = vmatpush3.bf16.msra.mxu1 %v3257_v16 }
 0x2ba   :  { %3259 = vmatprep.subr.bf16.mxu1 %v3471_v6  ;;  %v1300_v6 = vld [vmem:[%s4357_s5] sm:$0xff] }
 0x2bb   :  { %v3264_v25 = vpack.c.bf16 %v1302_v24, %v1300_v6  ;;  %v2791_v6 = vld [vmem:[%s4357_s5 + $0x1d8] sm:$0xff]  ;;  %v3328_v24 = vpack.c.bf16 %v2786_v22, %v2784_v21  ;;  %v2766_v21 = vld [vmem:[%s4357_s5 + $0x160] sm:$0xff]  ;;  %v2768_v22 = vld [vmem:[%s4357_s5 + $0x170] sm:$0xff] }
 0x2bc   :  { %v3330_v26 = vpack.c.bf16 %v2791_v6, %v2789_v23  ;;  %v1402_v23 = vld [vmem:[%s4358_s6 + $0x18] sm:$0xff]  ;;  %v3316_v6 = vpack.c.bf16 %v2768_v22, %v2766_v21  ;;  %v2798_v21 = vld [vmem:[%s4358_s6 + $0x60] sm:$0xff] }
 0x2bd   :  { %3261 = vmatpush3.bf16.msra.mxu1 %v3260_v19  ;;  %3265 = vmatpush1.bf16.msra.mxu0 %v3264_v25 }
 0x2be   :  { %3267 = vmatprep.subr.bf16.mxu0 %v3266_v28  ;;  %v2790_v28 = vld [vmem:[%s4357_s5 + $0x1d0] sm:$0xff] }
 0x2c0   :  { %3167 = vmatmul.mubr.msk.f32.vlgmr.msra.gmra.mrb[12].mxu1 %vm648_vm4, %v3652_v47  ;;  %v3280_v47 = vpack.c.bf16 %v2726_v41, %v2724_v40 }
 0x2c1   :  { %3171 = vmatprep.mubr.msk.f32.mxu1 %vm34_vm0, %v2718_v20  ;;  %3269 = vmatpush1.bf16.msra.mxu0 %v3268_v31  ;;  %v3326_v20 = vpack.c.bf16 %v2787_v15, %v2785_v14  ;;  %v3332_v31 = vpack.c.bf16 %v2790_v28, %v2788_v27  ;;  %v2764_v14 = vld [vmem:[%s4357_s5 + $0x150] sm:$0xff]  ;;  %v2767_v15 = vld [vmem:[%s4357_s5 + $0x168] sm:$0xff] }
 0x2c2   :  { %3271 = vmatprep.subr.bf16.mxu0 %v3270_v34  ;;  %v2794_v34 = vld [vmem:[%s4357_s5 + $0x1f0] sm:$0xff]  ;;  %v2130_v28 = vld [vmem:[%s4359_s7 + $0x8] sm:$0xff] }
 0x2c3   :  { %v3336_v35 = vpack.c.bf16 %v2794_v34, %v2792_v33  ;;  %v2132_v33 = vld [vmem:[%s4359_s7 + $0x18] sm:$0xff] }
 0x2c5   :  { %3273 = vmatpush1.bf16.msra.mxu0 %v3272_v37 }
 0x2c6   :  { %3275 = vmatprep.subr.bf16.mxu0 %v3274_v2  ;;  %v1399_v2 = vld [vmem:[%s4358_s6] sm:$0xff] }
 0x2c9   :  { %3277 = vmatpush1.bf16.msra.mxu0 %v3276_v8  ;;  %v2763_v8 = vld [vmem:[%s4357_s5 + $0x148] sm:$0xff] }
 0x2ca   :  { %v3310_v12 = vpack.c.bf16 %v2765_v9, %v2763_v8 }
 0x393   :  { %v1208_v45 = vpop.f32.mrb[12].mxu1 }
 0x394   :  { %v3168_v48 = vpop.f32.mrb[13].mxu1  ;;  %3169 = vmatprep.subr.mxu1 %v1208_v45 }
 0x395   :  { %3170 = vmatpush3.msra.mxu1 %v1208_v45  ;;  %v2755_v48 = vld [vmem:[%s4357_s5 + $0x108] sm:$0xff] }
 0x396   :  { %3172 = vmatmul.mubr.msk.f32.vlgmr.msra.gmra.mrb[10].mxu1 %vm34_vm0, %v2719_v46  ;;  %3279 = vmatprep.subr.bf16.mxu1 %v3278_v44 }
 0x397   :  { %3281 = vmatpush1.bf16.msra.mxu1 %v3280_v47  ;;  %1484 = vmatprep.mubr.f32.mxu1 %v3469_v0 }
 0x398   :  { %3283 = vmatprep.subr.bf16.mxu1 %v3282_v49  ;;  %v2757_v49 = vld [vmem:[%s4357_s5 + $0x118] sm:$0xff] }
 0x399   :  { %v3302_v51 = vpack.c.bf16 %v2757_v49, %v2755_v48 }
 0x39b   :  { %3285 = vmatpush1.bf16.msra.mxu1 %v3284_v54 }
 0x39c   :  { %3287 = vmatprep.subr.bf16.mxu1 %v3286_v55  ;;  %v2744_v55 = vld [vmem:[%s4358_s6 + $0x30] sm:$0xff] }
 0x39f   :  { %3289 = vmatpush1.bf16.msra.mxu1 %v3288_v60 }
 0x3a0   :  { %3291 = vmatprep.subr.bf16.mxu1 %v3290_v61  ;;  %v2754_v61 = vld [vmem:[%s4357_s5 + $0x100] sm:$0xff] }
 0x3a1   :  { %v3304_v3 = vpack.c.bf16 %v2756_v62, %v2754_v61  ;;  %v2139_v62 = vld [vmem:[%s4359_s7 + $0x50] sm:$0xff] }
 0x3a3   :  { %3293 = vmatpush1.bf16.msra.mxu1 %v3292_v7  ;;  %v2760_v7 = vld [vmem:[%s4357_s5 + $0x130] sm:$0xff] }
 0x3a4   :  { %3323 = vmatprep.subr.bf16.mxu1 %v3322_v11  ;;  %v3308_v11 = vpack.c.bf16 %v2760_v7, %v2758_v5  ;;  %v2141_v5 = vld [vmem:[%s4359_s7 + $0x60] sm:$0xff]  ;;  %v2142_v7 = vld [vmem:[%s4359_s7 + $0x68] sm:$0xff] }
 0x3a5   :  { %v3368_v8 = vpack.c.bf16 %v2142_v7, %v2141_v5  ;;  %v2143_v5 = vld [vmem:[%s4359_s7 + $0x70] sm:$0xff]  ;;  %v2144_v7 = vld [vmem:[%s4359_s7 + $0x78] sm:$0xff] }
 0x469   :  { %v3173_v16 = vpop.f32.mrb[10].mxu1 }
 0x46a   :  { %v1287_v17 = vpop.f32.mrb[11].mxu1  ;;  %v3882_v25 = vmax.f32 %v3173_v16, 0.0  ;;  %v2769_v16 = vld [vmem:[%s4357_s5 + $0x178] sm:$0xff] }
 0x46b   :  { %v3863_v19 = vmax.f32 %v1287_v17, 0.0  ;;  %v1401_v17 = vld [vmem:[%s4358_s6 + $0x10] sm:$0xff] }
 0x46d   :  { %2722 = vmatmul.mubr.msk.f32.vlgmr.msra.gmra.mrb[6].mxu0 %vm648_vm4, %v3863_v19  ;;  %2740 = vmatmul.mubr.msk.f32.vlgmr.msra.gmra.mrb[14].mxu1 %vm648_vm4, %v3863_v19 }
 0x46e   :  { %3325 = vmatpush1.bf16.msra.mxu1 %v3324_v18  ;;  %1392 = vmatprep.mubr.f32.mxu0 %v3469_v0  ;;  %v3312_v18 = vpack.c.bf16 %v2764_v14, %v2762_v13 }
 0x46f   :  { %1490 = vmatprep.mubr.f32.mxu1 %v3469_v0  ;;  %3327 = vmatprep.subr.bf16.mxu1 %v3326_v20  ;;  %v3314_v20 = vpack.c.bf16 %v2769_v16, %v2767_v15  ;;  %v2822_v15 = vld [vmem:[%s4359_s7 + $0x180] sm:$0xff]  ;;  %v2823_v16 = vld [vmem:[%s4359_s7 + $0x188] sm:$0xff] }
 0x471   :  { %2723 = vmatmul.mubr.msk.f32.gmra.mrb[8].mxu0 %vm648_vm4, %v3882_v25  ;;  %2741 = vmatmul.mubr.msk.f32.gmra.mrb[16].mxu1 %vm648_vm4, %v3882_v25 }
 0x472   :  { %3329 = vmatpush1.bf16.msra.mxu1 %v3328_v24  ;;  %1994 = vmatprep.mubr.f32.mxu1 %v3469_v0  ;;  %v2145_v24 = vld [vmem:[%s4359_s7 + $0x80] sm:$0xff] }
 0x473   :  { %3331 = vmatprep.subr.bf16.mxu1 %v3330_v26  ;;  %1579 = vmatprep.mubr.f32.mxu0 %v3469_v0  ;;  %v2146_v26 = vld [vmem:[%s4359_s7 + $0x88] sm:$0xff] }
 0x474   :  { %v3342_v27 = vpack.c.bf16 %v2146_v26, %v2145_v24  ;;  %v2809_v24 = vld [vmem:[%s4359_s7 + $0x118] sm:$0xff]  ;;  %v2826_v26 = vld [vmem:[%s4359_s7 + $0x1a0] sm:$0xff] }
 0x476   :  { %3333 = vmatpush1.bf16.msra.mxu1 %v3332_v31  ;;  %v3346_v31 = vpack.c.bf16 %v2148_v30, %v2147_v29  ;;  %v2810_v29 = vld [vmem:[%s4359_s7 + $0x120] sm:$0xff]  ;;  %v2811_v30 = vld [vmem:[%s4359_s7 + $0x128] sm:$0xff] }
 0x477   :  { %3335 = vmatprep.subr.bf16.mxu1 %v3334_v32  ;;  %v2131_v32 = vld [vmem:[%s4359_s7 + $0x10] sm:$0xff] }
 0x478   :  { %v3348_v34 = vpack.c.bf16 %v2132_v33, %v2131_v32  ;;  %v2829_v32 = vld [vmem:[%s4359_s7 + $0x1b8] sm:$0xff]  ;;  %v2800_v33 = vld [vmem:[%s4358_s6 + $0x70] sm:$0xff] }
 0x47a   :  { %3337 = vmatpush1.bf16.msra.mxu1 %v3336_v35  ;;  %v2149_v35 = vld [vmem:[%s4359_s7 + $0xa0] sm:$0xff] }
 0x47b   :  { %3343 = vmatprep.subr.bf16.mxu1 %v3342_v27  ;;  %v2827_v27 = vld [vmem:[%s4359_s7 + $0x1a8] sm:$0xff] }
 0x47d   :  { %2796 = vmatmul.mubr.msk.f32.vlgmr.msra.gmra.mrb[18].mxu1 %vm648_vm4, %v3863_v19 }
 0x47e   :  { %2000 = vmatprep.mubr.f32.mxu1 %v3469_v0 }
 0x481   :  { %2797 = vmatmul.mubr.msk.f32.gmra.mrb[20].mxu1 %vm648_vm4, %v3882_v25 }
 0x540   :  { %v1388_v36 = vpop.f32.mrb[6].mxu0  ;;  %v1486_v37 = vpop.f32.mrb[14].mxu1 }
 0x541   :  { %v1390_v38 = vpop.f32.mrb[7].mxu0  ;;  %v1488_v39 = vpop.f32.mrb[15].mxu1 }
 0x544   :  { %v1394_v40 = vpop.f32.mrb[8].mxu0  ;;  %v1492_v41 = vpop.f32.mrb[16].mxu1 }
 0x545   :  { %v3300_v42 = vpack.c.bf16 %v1394_v40, %v1388_v36  ;;  %v3296_v43 = vpack.c.bf16 %v1492_v41, %v1486_v37  ;;  %v1396_v44 = vpop.f32.mrb[9].mxu0  ;;  %v1494_v45 = vpop.f32.mrb[17].mxu1  ;;  %v2150_v36 = vld [vmem:[%s4359_s7 + $0xa8] sm:$0xff]  ;;  %v2151_v41 = vld [vmem:[%s4359_s7 + $0xb0] sm:$0xff] }
 0x546   :  { %v3298_v46 = vpack.c.bf16 %v1396_v44, %v1390_v38  ;;  %v3294_v47 = vpack.c.bf16 %v1494_v45, %v1488_v39  ;;  %v3350_v37 = vpack.c.bf16 %v2150_v36, %v2149_v35  ;;  %v2133_v38 = vld [vmem:[%s4359_s7 + $0x20] sm:$0xff]  ;;  %v2134_v39 = vld [vmem:[%s4359_s7 + $0x28] sm:$0xff]  ;;  %v2135_v44 = vld [vmem:[%s4359_s7 + $0x30] sm:$0xff] }
 0x547   :  { %v3352_v40 = vpack.c.bf16 %v2134_v39, %v2133_v38  ;;  %v2136_v45 = vld [vmem:[%s4359_s7 + $0x38] sm:$0xff]  ;;  %v2812_v36 = vld [vmem:[%s4359_s7 + $0x130] sm:$0xff]  ;;  %v2830_v38 = vld [vmem:[%s4359_s7 + $0x1c0] sm:$0xff] }
 0x548   :  { %3295 = vmatprep.subr.bf16.mxu0 %v3294_v47  ;;  %v2154_v47 = vld [vmem:[%s4359_s7 + $0xc8] sm:$0xff]  ;;  %v3356_v48 = vpack.c.bf16 %v2136_v45, %v2135_v44  ;;  %v2833_v45 = vld [vmem:[%s4359_s7 + $0x1d8] sm:$0xff] }
 0x549   :  { %3297 = vmatpush1.bf16.msra.mxu0 %v3296_v43  ;;  %v2831_v39 = vld [vmem:[%s4359_s7 + $0x1c8] sm:$0xff] }
 0x54a   :  { %3299 = vmatprep.subr.bf16.mxu0 %v3298_v46  ;;  %v2153_v46 = vld [vmem:[%s4359_s7 + $0xc0] sm:$0xff]  ;;  %v2815_v44 = vld [vmem:[%s4359_s7 + $0x148] sm:$0xff] }
 0x54b   :  { %v3358_v49 = vpack.c.bf16 %v2154_v47, %v2153_v46 }
 0x54c   :  { %2746 = vmatmul.mubr.msk.f32.vlgmr.msra.gmra.mrb[10].mxu0 %vm1502_vm5, %v2742_v50  ;;  %v2137_v50 = vld [vmem:[%s4359_s7 + $0x40] sm:$0xff] }
 0x54d   :  { %3301 = vmatpush1.bf16.msra.mxu0 %v3300_v42  ;;  %1585 = vmatprep.mubr.f32.mxu0 %v3469_v0  ;;  %v2152_v42 = vld [vmem:[%s4359_s7 + $0xb8] sm:$0xff] }
 0x54e   :  { %3303 = vmatprep.subr.bf16.mxu0 %v3302_v51  ;;  %v3354_v43 = vpack.c.bf16 %v2152_v42, %v2151_v41  ;;  %v2138_v51 = vld [vmem:[%s4359_s7 + $0x48] sm:$0xff]  ;;  %v3390_v42 = vpack.c.bf16 %v2831_v39, %v2830_v38 }
 0x550   :  { %v3928_v53 = vpop.f32.mrb[18].mxu1  ;;  %2747 = vmatmul.mubr.msk.f32.gmra.mrb[12].mxu0 %vm1502_vm5, %v2743_v52  ;;  %v2155_v52 = vld [vmem:[%s4359_s7 + $0xd0] sm:$0xff] }
 0x551   :  { %v3931_v54 = vpop.f32.mrb[19].mxu1  ;;  %1591 = vmatprep.mubr.f32.mxu0 %v3469_v0 }
 0x554   :  { %v3937_v56 = vpop.f32.mrb[20].mxu1  ;;  %2748 = vmatmul.mubr.msk.f32.gmra.mrb[14].mxu0 %vm1502_vm5, %v2744_v55  ;;  %v2156_v55 = vld [vmem:[%s4359_s7 + $0xd8] sm:$0xff] }
 0x555   :  { %v3340_v57 = vpack.c.bf16 %v3937_v56, %v3928_v53  ;;  %v3942_v58 = vpop.f32.mrb[21].mxu1  ;;  %1597 = vmatprep.mubr.f32.mxu0 %v3469_v0  ;;  %v3362_v61 = vpack.c.bf16 %v2156_v55, %v2155_v52  ;;  %v2775_v53 = vld [vmem:[%s4358_s6 + $0x58] sm:$0xff]  ;;  %v2806_v56 = vld [vmem:[%s4359_s7 + $0x100] sm:$0xff] }
 0x556   :  { %v3338_v60 = vpack.c.bf16 %v3942_v58, %v3931_v54  ;;  %v2774_v54 = vld [vmem:[%s4358_s6 + $0x50] sm:$0xff] }
 0x557   :  { %v2824_v58 = vld [vmem:[%s4359_s7 + $0x190] sm:$0xff] }
 0x558   :  { %2749 = vmatmul.mubr.msk.f32.gmra.mrb[16].mxu0 %vm1502_vm5, %v2745_v59  ;;  %v3360_v59 = vpack.c.bf16 %v2138_v51, %v2137_v50  ;;  %v2834_v50 = vld [vmem:[%s4359_s7 + $0x1e0] sm:$0xff]  ;;  %v2835_v51 = vld [vmem:[%s4359_s7 + $0x1e8] sm:$0xff] }
 0x559   :  { %1680 = vmatprep.mubr.f32.mxu0 %v3469_v0  ;;  %v3398_v55 = vpack.c.bf16 %v2835_v51, %v2834_v50  ;;  %v2839_v50 = vld [vmem:[%s4360_s8 + $0x48] sm:$0xff]  ;;  %v2840_v51 = vld [vmem:[%s4360_s8 + $0x50] sm:$0xff] }
 0x55c   :  { %2750 = vmatmul.mubr.msk.f32.vlgmr.msra.gmra.mrb[10].mxu0 %vm1502_vm5, %v1399_v2  ;;  %v2158_v2 = vld [vmem:[%s4359_s7 + $0xe8] sm:$0xff] }
 0x55d   :  { %3305 = vmatpush1.bf16.msra.mxu0 %v3304_v3  ;;  %1686 = vmatprep.mubr.f32.mxu0 %v3469_v0  ;;  %v3364_v3 = vpack.c.bf16 %v2140_v63, %v2139_v62  ;;  %v2159_v63 = vld [vmem:[%s4359_s7 + $0xf0] sm:$0xff] }
 0x55e   :  { %3307 = vmatprep.subr.bf16.mxu0 %v3306_v4  ;;  %v3366_v4 = vpack.c.bf16 %v2158_v2, %v2157_v1  ;;  %v2160_v1 = vld [vmem:[%s4359_s7 + $0xf8] sm:$0xff]  ;;  %v2836_v2 = vld [vmem:[%s4359_s7 + $0x1f0] sm:$0xff] }
 0x560   :  { %2751 = vmatmul.mubr.msk.f32.gmra.mrb[12].mxu0 %vm1502_vm5, %v1400_v10 }
 0x561   :  { %3309 = vmatpush1.bf16.msra.mxu0 %v3308_v11  ;;  %1692 = vmatprep.mubr.f32.mxu0 %v3469_v0 }
 0x562   :  { %3311 = vmatprep.subr.bf16.mxu0 %v3310_v12 }
 0x564   :  { %2752 = vmatmul.mubr.msk.f32.gmra.mrb[14].mxu0 %vm1502_vm5, %v1401_v17  ;;  %v2772_v17 = vld [vmem:[%s4358_s6 + $0x40] sm:$0xff] }
 0x565   :  { %3313 = vmatpush1.bf16.msra.mxu0 %v3312_v18  ;;  %1698 = vmatprep.mubr.f32.mxu0 %v3469_v0  ;;  %v3374_v18 = vpack.c.bf16 %v2823_v16, %v2822_v15 }
 0x566   :  { %3315 = vmatprep.subr.bf16.mxu0 %v3314_v20  ;;  %v2773_v20 = vld [vmem:[%s4358_s6 + $0x48] sm:$0xff] }
 0x568   :  { %2753 = vmatmul.mubr.msk.f32.gmra.mrb[16].mxu0 %vm1502_vm5, %v1402_v23 }
 0x569   :  { %3317 = vmatpush1.bf16.msra.mxu0 %v3316_v6  ;;  %1786 = vmatprep.mubr.f32.mxu0 %v3469_v0  ;;  %v2808_v6 = vld [vmem:[%s4359_s7 + $0x110] sm:$0xff] }
 0x56c   :  { %2770 = vmatmul.mubr.msk.f32.vlgmr.msra.gmra.mrb[18].mxu0 %vm648_vm4, %v3863_v19  ;;  %v2129_v19 = vld [vmem:[%s4359_s7] sm:$0xff] }
 0x56d   :  { %1792 = vmatprep.mubr.f32.mxu0 %v3469_v0 }
 0x570   :  { %2771 = vmatmul.mubr.msk.f32.gmra.mrb[20].mxu0 %vm648_vm4, %v3882_v25  ;;  %v3344_v25 = vpack.c.bf16 %v2130_v28, %v2129_v19  ;;  %v2799_v19 = vld [vmem:[%s4358_s6 + $0x68] sm:$0xff]  ;;  %v3380_v28 = vpack.c.bf16 %v2809_v24, %v2808_v6  ;;  %v2838_v6 = vld [vmem:[%s4360_s8 + $0x40] sm:$0xff] }
 0x571   :  { %1880 = vmatprep.mubr.f32.mxu0 %v3469_v0 }
 0x572   :  { %3345 = vmatpush3.bf16.msra.mxu1 %v3344_v25  ;;  %v3382_v25 = vpack.c.bf16 %v2827_v27, %v2826_v26 }
 0x573   :  { %3347 = vmatprep.subr.bf16.mxu1 %v3346_v31  ;;  %v2828_v31 = vld [vmem:[%s4359_s7 + $0x1b0] sm:$0xff] }
 0x574   :  { %v3386_v35 = vpack.c.bf16 %v2829_v32, %v2828_v31 }
 0x576   :  { %3349 = vmatpush3.bf16.msra.mxu1 %v3348_v34  ;;  %v3384_v34 = vpack.c.bf16 %v2811_v30, %v2810_v29 }
 0x577   :  { %3351 = vmatprep.subr.bf16.mxu1 %v3350_v37  ;;  %v2813_v37 = vld [vmem:[%s4359_s7 + $0x138] sm:$0xff] }
 0x578   :  { %v3388_v41 = vpack.c.bf16 %v2813_v37, %v2812_v36 }
 0x57a   :  { %3353 = vmatpush3.bf16.msra.mxu1 %v3352_v40  ;;  %v2801_v40 = vld [vmem:[%s4358_s6 + $0x78] sm:$0xff] }
 0x57b   :  { %3355 = vmatprep.subr.bf16.mxu1 %v3354_v43  ;;  %v2814_v43 = vld [vmem:[%s4359_s7 + $0x140] sm:$0xff] }
 0x57c   :  { %v3392_v46 = vpack.c.bf16 %v2815_v44, %v2814_v43 }
 0x57e   :  { %3357 = vmatpush3.bf16.msra.mxu1 %v3356_v48  ;;  %v2816_v48 = vld [vmem:[%s4359_s7 + $0x150] sm:$0xff] }
 0x57f   :  { %3359 = vmatprep.subr.bf16.mxu1 %v3358_v49  ;;  %v2817_v49 = vld [vmem:[%s4359_s7 + $0x158] sm:$0xff] }
 0x580   :  { %v3396_v52 = vpack.c.bf16 %v2817_v49, %v2816_v48 }
 0x582   :  { %3361 = vmatpush3.bf16.msra.mxu1 %v3360_v59  ;;  %v2818_v59 = vld [vmem:[%s4359_s7 + $0x160] sm:$0xff] }
 0x583   :  { %3363 = vmatprep.subr.bf16.mxu1 %v3362_v61  ;;  %v2819_v61 = vld [vmem:[%s4359_s7 + $0x168] sm:$0xff] }
 0x584   :  { %v3400_v62 = vpack.c.bf16 %v2819_v61, %v2818_v59  ;;  %v2843_v59 = vld [vmem:[%s4360_s8 + $0x68] sm:$0xff]  ;;  %v2844_v61 = vld [vmem:[%s4360_s8 + $0x70] sm:$0xff] }
 0x586   :  { %3365 = vmatpush3.bf16.msra.mxu1 %v3364_v3  ;;  %v3370_v3 = vpack.c.bf16 %v2160_v1, %v2159_v63  ;;  %v2246_v63 = vld [vmem:[%s4360_s8] sm:$0xff]  ;;  %v2247_v1 = vld [vmem:[%s4360_s8 + $0x8] sm:$0xff] }
 0x587   :  { %3367 = vmatprep.subr.bf16.mxu1 %v3366_v4  ;;  %v2837_v4 = vld [vmem:[%s4359_s7 + $0x1f8] sm:$0xff] }
 0x58a   :  { %3369 = vmatpush3.bf16.msra.mxu1 %v3368_v8  ;;  %v3402_v8 = vpack.c.bf16 %v2837_v4, %v2836_v2  ;;  %v2248_v2 = vld [vmem:[%s4360_s8 + $0x10] sm:$0xff]  ;;  %v2250_v4 = vld [vmem:[%s4360_s8 + $0x20] sm:$0xff] }
 0x58b   :  { %3371 = vmatprep.subr.bf16.mxu1 %v3370_v3  ;;  %v2249_v3 = vld [vmem:[%s4360_s8 + $0x18] sm:$0xff] }
 0x63f   :  { %v1788_v9 = vpop.f32.mrb[18].mxu0 }
 0x640   :  { %v1790_v10 = vpop.f32.mrb[19].mxu0 }
 0x643   :  { %v1794_v11 = vpop.f32.mrb[20].mxu0 }
 0x644   :  { %v3320_v12 = vpack.c.bf16 %v1794_v11, %v1788_v9  ;;  %v1796_v13 = vpop.f32.mrb[21].mxu0  ;;  %v3372_v9 = vpack.c.bf16 %v2144_v7, %v2143_v5  ;;  %v2821_v11 = vld [vmem:[%s4359_s7 + $0x178] sm:$0xff]  ;;  %v2251_v5 = vld [vmem:[%s4360_s8 + $0x28] sm:$0xff]  ;;  %v2252_v7 = vld [vmem:[%s4360_s8 + $0x30] sm:$0xff] }
 0x645   :  { %v3318_v14 = vpack.c.bf16 %v1796_v13, %v1790_v10  ;;  %v2820_v10 = vld [vmem:[%s4359_s7 + $0x170] sm:$0xff] }
 0x646   :  { %3373 = vmatpush3.bf16.msra.mxu1 %v3372_v9 }
 0x647   :  { %3319 = vmatprep.subr.bf16.mxu0 %v3318_v14 }
 0x648   :  { %3321 = vmatpush1.bf16.msra.mxu0 %v3320_v12  ;;  %v3404_v12 = vpack.c.bf16 %v2821_v11, %v2820_v10 }
 0x649   :  { %3339 = vmatprep.subr.bf16.mxu0 %v3338_v60  ;;  %v2825_v60 = vld [vmem:[%s4359_s7 + $0x198] sm:$0xff] }
 0x64a   :  { %v3378_v23 = vpack.c.bf16 %v2825_v60, %v2824_v58 }
 0x64b   :  { %2776 = vmatmul.mubr.msk.f32.vlgmr.msra.gmra.mrb[10].mxu0 %vm1502_vm5, %v2772_v17 }
 0x64c   :  { %3341 = vmatpush1.bf16.msra.mxu0 %v3340_v57  ;;  %1886 = vmatprep.mubr.f32.mxu0 %v3469_v0  ;;  %v2807_v57 = vld [vmem:[%s4359_s7 + $0x108] sm:$0xff] }
 0x64d   :  { %3375 = vmatprep.subr.bf16.mxu0 %v3374_v18  ;;  %v3376_v22 = vpack.c.bf16 %v2807_v57, %v2806_v56 }
 0x64f   :  { %2777 = vmatmul.mubr.msk.f32.gmra.mrb[12].mxu0 %vm1502_vm5, %v2773_v20 }
 0x650   :  { %1892 = vmatprep.mubr.f32.mxu0 %v3469_v0 }
 0x653   :  { %2778 = vmatmul.mubr.msk.f32.gmra.mrb[14].mxu0 %vm1502_vm5, %v2774_v54 }
 0x654   :  { %1898 = vmatprep.mubr.f32.mxu0 %v3469_v0 }
 0x657   :  { %2779 = vmatmul.mubr.msk.f32.gmra.mrb[16].mxu0 %vm1502_vm5, %v2775_v53 }
 0x658   :  { %2088 = vmatprep.mubr.f32.mxu0 %v3469_v0 }
 0x65b   :  { %2802 = vmatmul.mubr.msk.f32.vlgmr.msra.gmra.mrb[10].mxu0 %vm1502_vm5, %v2798_v21 }
 0x65c   :  { %2094 = vmatprep.mubr.f32.mxu0 %v3469_v0  ;;  %3377 = vmatpush3.bf16.msra.mxu0 %v3376_v22 }
 0x65d   :  { %3379 = vmatprep.subr.bf16.mxu0 %v3378_v23 }
 0x65f   :  { %2803 = vmatmul.mubr.msk.f32.gmra.mrb[12].mxu0 %vm1502_vm5, %v2799_v19 }
 0x660   :  { %2100 = vmatprep.mubr.f32.mxu0 %v3469_v0  ;;  %3381 = vmatpush3.bf16.msra.mxu0 %v3380_v28 }
 0x661   :  { %3383 = vmatprep.subr.bf16.mxu0 %v3382_v25 }
 0x663   :  { %2804 = vmatmul.mubr.msk.f32.gmra.mrb[14].mxu0 %vm1502_vm5, %v2800_v33 }
 0x664   :  { %2106 = vmatprep.mubr.f32.mxu0 %v3469_v0  ;;  %3385 = vmatpush3.bf16.msra.mxu0 %v3384_v34  ;;  %v2832_v0 = vld [vmem:[%s4359_s7 + $0x1d0] sm:$0xff] }
 0x665   :  { %3387 = vmatprep.subr.bf16.mxu0 %v3386_v35  ;;  %v3394_v47 = vpack.c.bf16 %v2833_v45, %v2832_v0 }
 0x667   :  { %2805 = vmatmul.mubr.msk.f32.gmra.mrb[16].mxu0 %vm1502_vm5, %v2801_v40 }
 0x668   :  { %3389 = vmatpush3.bf16.msra.mxu0 %v3388_v41 }
 0x669   :  { %3391 = vmatprep.subr.bf16.mxu0 %v3390_v42 }
 0x66c   :  { %3393 = vmatpush3.bf16.msra.mxu0 %v3392_v46 }
 0x66d   :  { %3395 = vmatprep.subr.bf16.mxu0 %v3394_v47 }
 0x670   :  { %3397 = vmatpush3.bf16.msra.mxu0 %v3396_v52  ;;  %v2841_v52 = vld [vmem:[%s4360_s8 + $0x58] sm:$0xff] }
 0x671   :  { %3399 = vmatprep.subr.bf16.mxu0 %v3398_v55  ;;  %v2842_v55 = vld [vmem:[%s4360_s8 + $0x60] sm:$0xff] }
 0x674   :  { %3401 = vmatpush3.bf16.msra.mxu0 %v3400_v62  ;;  %v2845_v62 = vld [vmem:[%s4360_s8 + $0x78] sm:$0xf] }
 0x675   :  { %3403 = vmatprep.subr.bf16.mxu0 %v3402_v8  ;;  %v2253_v8 = vld [vmem:[%s4360_s8 + $0x38] sm:$0xf] }
 0x678   :  { %3405 = vmatpush3.bf16.msra.mxu0 %v3404_v12 }
 0x72e   :  { %v2090_v13 = vpop.f32.mrb[10].mxu0 }
 0x72f   :  { %v2092_v14 = vpop.f32.mrb[11].mxu0  ;;  %v2121_v16 = vmax.f32 %v2090_v13, 0.0 }
 0x730   :  { %v2122_v15 = vmax.f32 %v2092_v14, 0.0 }
 0x732   :  { %v2096_v17 = vpop.f32.mrb[12].mxu0  ;;  %2225 = vmatprep.mubr.f32.mxu1 %v2122_v15  ;;  %2351 = vmatprep.mubr.f32.mxu0 %v2122_v15 }
 0x733   :  { %v2098_v18 = vpop.f32.mrb[13].mxu0  ;;  %2226 = vmatmul.mubr.f32.vlgmr.msra.gmra.mrb[22].mxu1 %v2121_v16  ;;  %2352 = vmatmul.mubr.f32.vlgmr.msra.gmra.mrb[22].mxu0 %v2121_v16  ;;  %v2123_v54 = vmax.f32 %v2096_v17, 0.0 }
 0x734   :  { %v2124_v20 = vmax.f32 %v2098_v18, 0.0 }
 0x736   :  { %v2102_v53 = vpop.f32.mrb[14].mxu0  ;;  %2230 = vmatprep.mubr.f32.mxu1 %v2124_v20  ;;  %2356 = vmatprep.mubr.f32.mxu0 %v2124_v20 }
 0x737   :  { %v2104_v56 = vpop.f32.mrb[15].mxu0  ;;  %2231 = vmatmul.mubr.f32.gmra.mrb[24].mxu1 %v2123_v54  ;;  %2357 = vmatmul.mubr.f32.gmra.mrb[24].mxu0 %v2123_v54  ;;  %v2125_v58 = vmax.f32 %v2102_v53, 0.0 }
 0x738   :  { %v2126_v57 = vmax.f32 %v2104_v56, 0.0 }
 0x73a   :  { %v2108_v60 = vpop.f32.mrb[16].mxu0  ;;  %2235 = vmatprep.mubr.f32.mxu1 %v2126_v57  ;;  %2361 = vmatprep.mubr.f32.mxu0 %v2126_v57 }
 0x73b   :  { %v2110_v21 = vpop.f32.mrb[17].mxu0  ;;  %2236 = vmatmul.mubr.f32.gmra.mrb[26].mxu1 %v2125_v58  ;;  %2362 = vmatmul.mubr.f32.gmra.mrb[26].mxu0 %v2125_v58  ;;  %v2127_v23 = vmax.f32 %v2108_v60, 0.0 }
 0x73c   :  { %v2128_v22 = vmax.f32 %v2110_v21, 0.0 }
 0x73e   :  { %2240 = vmatprep.mubr.f32.mxu1 %v2128_v22  ;;  %2366 = vmatprep.mubr.f32.mxu0 %v2128_v22 }
 0x73f   :  { %2241 = vmatmul.mubr.f32.gmra.mrb[28].mxu1 %v2127_v23  ;;  %2367 = vmatmul.mubr.f32.gmra.mrb[28].mxu0 %v2127_v23 }
 0x740   :  { %3182 = vmatprep.mubr.msk.f32.mxu1 %vm2381_vm6, %v2838_v6 }
 0x806   :  { %v2958_v24 = vpop.f32.mrb[22].mxu1  ;;  %v3002_v26 = vpop.f32.mrb[22].mxu0 }
 0x807   :  { %v2959_v27 = vpop.f32.mrb[23].mxu1  ;;  %v3003_v19 = vpop.f32.mrb[23].mxu0 }
 0x808   :  { %v2960_v28 = vadd.f32 %v2959_v27, %v2958_v24  ;;  %v3004_v25 = vadd.f32 %v3003_v19, %v3002_v26 }
 0x80a   :  { %v2961_v29 = vpop.f32.mrb[24].mxu1  ;;  %v3005_v30 = vpop.f32.mrb[24].mxu0 }
 0x80b   :  { %v2962_v31 = vpop.f32.mrb[25].mxu1  ;;  %v3006_v32 = vpop.f32.mrb[25].mxu0 }
 0x80c   :  { %v2963_v33 = vadd.f32 %v2962_v31, %v2961_v29  ;;  %v3007_v34 = vadd.f32 %v3006_v32, %v3005_v30 }
 0x80e   :  { %v3414_v35 = vpack.c.bf16 %v2963_v33, %v2960_v28  ;;  %v3406_v36 = vpack.c.bf16 %v3007_v34, %v3004_v25  ;;  %v2964_v37 = vpop.f32.mrb[26].mxu1  ;;  %v3008_v38 = vpop.f32.mrb[26].mxu0 }
 0x80f   :  { %v2965_v39 = vpop.f32.mrb[27].mxu1  ;;  %v3009_v40 = vpop.f32.mrb[27].mxu0 }
 0x810   :  { %v2966_v41 = vadd.f32 %v2965_v39, %v2964_v37  ;;  %v3010_v42 = vadd.f32 %v3009_v40, %v3008_v38  ;;  %3407 = vmatprep.subr.bf16.mxu1 %v3406_v36 }
 0x811   :  { %3409 = vmatpush3.bf16.msra.mxu1 %v3406_v36 }
 0x812   :  { %v2967_v43 = vpop.f32.mrb[28].mxu1  ;;  %v3011_v44 = vpop.f32.mrb[28].mxu0 }
 0x813   :  { %v2968_v0 = vpop.f32.mrb[29].mxu1  ;;  %v3012_v45 = vpop.f32.mrb[29].mxu0 }
 0x814   :  { %v2969_v46 = vadd.f32 %v2968_v0, %v2967_v43  ;;  %v3013_v47 = vadd.f32 %v3012_v45, %v3011_v44 }
 0x816   :  { %v3418_v48 = vpack.c.bf16 %v2969_v46, %v2966_v41  ;;  %v3410_v49 = vpack.c.bf16 %v3013_v47, %v3010_v42 }
 0x818   :  { %3411 = vmatprep.subr.bf16.mxu1 %v3410_v49 }
 0x819   :  { %3413 = vmatpush3.bf16.msra.mxu1 %v3410_v49 }
 0x81a   :  { %3415 = vmatprep.subr.bf16.mxu1 %v3414_v35 }
 0x81c   :  { %3183 = vmatmul.mubr.msk.f32.vlgmr.msra.gmra.mrb[30].mxu1 %vm2381_vm6, %v2839_v50 }
 0x81d   :  { %3417 = vmatpush3.bf16.msra.mxu1 %v3414_v35  ;;  %3185 = vmatprep.mubr.msk.f32.mxu1 %vm2381_vm6, %v2840_v51 }
 0x81e   :  { %3419 = vmatprep.subr.bf16.mxu1 %v3418_v48 }
 0x820   :  { %3186 = vmatmul.mubr.msk.f32.gmra.mrb[32].mxu1 %vm2381_vm6, %v2841_v52 }
 0x821   :  { %3421 = vmatpush3.bf16.msra.mxu1 %v3418_v48  ;;  %3188 = vmatprep.mubr.msk.f32.mxu1 %vm2381_vm6, %v2842_v55 }
 0x824   :  { %3189 = vmatmul.mubr.msk.f32.gmra.mrb[34].mxu1 %vm2381_vm6, %v2843_v59 }
 0x825   :  { %3191 = vmatprep.mubr.msk.f32.mxu1 %vm2381_vm6, %v2844_v61 }
 0x828   :  { %3192 = vmatmul.mubr.msk.f32.gmra.mrb[36].mxu1 %vm2381_vm6, %v2845_v62 }
 0x829   :  { %3202 = vmatprep.mubr.msk.f32.mxu1 %vm2381_vm6, %v2246_v63 }
 0x82c   :  { %3203 = vmatmul.mubr.msk.f32.vlgmr.msra.gmra.mrb[30].mxu1 %vm2381_vm6, %v2247_v1 }
 0x82d   :  { %3205 = vmatprep.mubr.msk.f32.mxu1 %vm2381_vm6, %v2248_v2 }
 0x830   :  { %3206 = vmatmul.mubr.msk.f32.gmra.mrb[32].mxu1 %vm2381_vm6, %v2249_v3 }
 0x831   :  { %3208 = vmatprep.mubr.msk.f32.mxu1 %vm2381_vm6, %v2250_v4 }
 0x834   :  { %3209 = vmatmul.mubr.msk.f32.gmra.mrb[34].mxu1 %vm2381_vm6, %v2251_v5 }
 0x835   :  { %3211 = vmatprep.mubr.msk.f32.mxu1 %vm2381_vm6, %v2252_v7 }
 0x838   :  { %3212 = vmatmul.mubr.msk.f32.gmra.mrb[36].mxu1 %vm2381_vm6, %v2253_v8 }
 0x8ff   :  { %v3204_v9 = vpop.f32.mrb[30].mxu1 }
 0x900   :  { %v2641_v10 = vmax.f32 %v3204_v9, 0.0  ;;  %v2601_v11 = vpop.f32.mrb[31].mxu1 }
 0x901   :  { %v2640_v12 = vmax.f32 %v2601_v11, 0.0 }
 0x902   :  { %2650 = vst.msk [vmem:[%s4361_s9 + $0x8] sm:$0xff] %vm2648_vm7, %v2641_v10 }
 0x903   :  { %2649 = vst.msk [vmem:[%s4361_s9] sm:$0xff] %vm2648_vm7, %v2640_v12  ;;  %v3207_v13 = vpop.f32.mrb[32].mxu1 }
 0x904   :  { %v2643_v14 = vmax.f32 %v3207_v13, 0.0  ;;  %v2611_v15 = vpop.f32.mrb[33].mxu1 }
 0x905   :  { %v2642_v16 = vmax.f32 %v2611_v15, 0.0 }
 0x906   :  { %2652 = vst.msk [vmem:[%s4361_s9 + $0x18] sm:$0xff] %vm2648_vm7, %v2643_v14 }
 0x907   :  { %2651 = vst.msk [vmem:[%s4361_s9 + $0x10] sm:$0xff] %vm2648_vm7, %v2642_v16  ;;  %v3210_v17 = vpop.f32.mrb[34].mxu1 }
 0x908   :  { %v2645_v18 = vmax.f32 %v3210_v17, 0.0  ;;  %v2621_v20 = vpop.f32.mrb[35].mxu1 }
 0x909   :  { %v2644_v54 = vmax.f32 %v2621_v20, 0.0 }
 0x90a   :  { %2654 = vst.msk [vmem:[%s4361_s9 + $0x28] sm:$0xff] %vm2648_vm7, %v2645_v18 }
 0x90b   :  { %2653 = vst.msk [vmem:[%s4361_s9 + $0x20] sm:$0xff] %vm2648_vm7, %v2644_v54  ;;  %v3213_v53 = vpop.f32.mrb[36].mxu1 }
 0x90c   :  { %v2647_v56 = vmax.f32 %v3213_v53, 0.0  ;;  %v2631_v57 = vpop.f32.mrb[37].mxu1 }
 0x90d   :  { %v2646_v58 = vmax.f32 %v2631_v57, 0.0 }
 0x90e   :  { %2657 = vst.msk [vmem:[%s4361_s9 + $0x38] sm:$0xf] %vm2656_vm8, %v2647_v56 }
 0x90f   :  { %2655 = vst.msk [vmem:[%s4361_s9 + $0x30] sm:$0xff] %vm2648_vm7, %v2646_v58 }

</bundles_post_ra>
